<compile_context>
chip_gen: v7x
topology: tpu7x:2x2x1
jax: 0.10.0
libtpu: 0.0.40
codegen_flags: <defaults>
</compile_context>

<pallas_src>
import math

import jax
import jax.numpy as jnp
from jax.experimental import pallas as pl
from jax.experimental.pallas import tpu as pltpu

_HIDDEN = (128, 256, 128, 128)
_LANE = 128
_TWO_PI = 6.283185307179586
_INV_TWO_PI = 0.15915494309189535


def _round_up(v, m):
    return -(-v // m) * m


def _fast_sin(y):
    """sin(y) for |y| bounded to a few*pi (SIREN pre-activation range).

    Single fold to [-pi, pi] + odd degree-11 polynomial (truncated Taylor,
    |err| <= pi^13/13! ~ 4.7e-4 on [-pi, pi]) — far cheaper on the VALU than
    the generic full-range jnp.sin lowering."""
    k = jnp.floor(y * _INV_TWO_PI + 0.5)
    r = y - k * _TWO_PI                       # r in [-pi, pi]
    r2 = r * r
    p = -2.5052108385441720e-08               # -1/11!
    p = p * r2 + 2.7557319223985893e-06       # +1/9!
    p = p * r2 - 1.9841269841269841e-04       # -1/7!
    p = p * r2 + 8.3333333333333333e-03       # +1/5!
    p = p * r2 - 1.6666666666666666e-01       # -1/3!
    p = p * r2 + 1.0
    return r * p


def siren_kernel(x_ref,
                 w1_ref, b1_ref,
                 w2_ref, b2_ref,
                 w3_ref, b3_ref,
                 w4_ref, b4_ref,
                 w5_ref, b5_ref,
                 o_ref):
    """Whole SIREN forward for one batch tile, entirely in VMEM."""
    x = x_ref[...]                       # (T, cin)  f32
    w1 = w1_ref[...]                     # (cin, H1) f32 (VPU path)
    t, cin = x.shape
    h1 = w1.shape[1]

    # ---- layer 1: K = cin is tiny -> broadcast FMAs on the VPU, skip the MXU.
    acc = jnp.broadcast_to(b1_ref[...], (t, h1))
    for k in range(cin):                 # static, small (e.g. 4)
        acc = acc + x[:, k:k + 1] * w1[k:k + 1, :]
    h = _fast_sin(acc)

    # ---- layers 2-4: bf16 MXU matmuls, f32 accumulate, f32 bias/fast-sin. ----
    for w_ref, b_ref in ((w2_ref, b2_ref), (w3_ref, b3_ref), (w4_ref, b4_ref)):
        y = jnp.dot(h.astype(jnp.bfloat16), w_ref[...],
                    preferred_element_type=jnp.float32) + b_ref[...]
        h = _fast_sin(y)

    # ---- layer 5: output padded to 128 lanes (lane-dense store) + ReLU. ----
    y = jnp.dot(h.astype(jnp.bfloat16), w5_ref[...],
                preferred_element_type=jnp.float32) + b5_ref[...]
    o_ref[...] = jnp.maximum(y, 0.0).astype(o_ref.dtype)


def init_siren_params(key, in_channels, out_channels):
    """f32 params matching torch.nn.Linear defaults:
       W, b ~ U(-1/sqrt(fan_in), 1/sqrt(fan_in)).
       Weights stored transposed as (fan_in, fan_out); biases as (1, fan_out)."""
    dims = [in_channels, *_HIDDEN, out_channels]
    params = []
    for fan_in, fan_out in zip(dims[:-1], dims[1:]):
        key, kw, kb = jax.random.split(key, 3)
        bound = 1.0 / math.sqrt(fan_in)
        w_t = jax.random.uniform(kw, (fan_in, fan_out), jnp.float32,
                                 minval=-bound, maxval=bound)
        b = jax.random.uniform(kb, (1, fan_out), jnp.float32,
                               minval=-bound, maxval=bound)
        params.append((w_t, b))
    return params


def prepare_params(params):
    """Convert f32 params to the kernel layout:
       * layer-1 weight stays f32 (used on the VPU),
       * layers 2-5 weights stored bf16 (MXU operands),
       * last layer zero-padded to a multiple of 128 output columns,
       * all biases stay f32.
       Returns (kernel_params, out_channels)."""
    (w1, b1), (w2, b2), (w3, b3), (w4, b4), (w5, b5) = params
    cout = w5.shape[1]
    out_pad = max(_LANE, _round_up(cout, _LANE))
    pad = out_pad - cout
    w5p = jnp.pad(w5, ((0, 0), (0, pad))).astype(jnp.bfloat16)
    b5p = jnp.pad(b5, ((0, 0), (0, pad)))
    kparams = [(w1, b1),
               (w2.astype(jnp.bfloat16), b2),
               (w3.astype(jnp.bfloat16), b3),
               (w4.astype(jnp.bfloat16), b4),
               (w5p, b5p)]
    return kparams, cout


def siren_forward(x, kparams, out_channels, *, batch_tile=2048):
    """x: [N, in_channels] f32.  Returns [N, out_channels] f32."""
    n, cin = x.shape
    out_pad = kparams[-1][0].shape[1]

    # --- tile selection -------------------------------------------------
    # Always a multiple of 8 (sublane constraint), and aim for >= 2 grid steps
    # so ("parallel",) can shard batch tiles across the two v7x TensorCores.
    batch_tile = max(8, _round_up(int(batch_tile), 8))
    n8 = _round_up(max(n, 1), 8)
    if n8 <= 8:
        tile = 8
    else:
        two_step = _round_up(-(-n8 // 2), 8)   # round_up(cdiv(n8, 2), 8)
        tile = max(8, min(batch_tile, two_step))
    n_pad = _round_up(n, tile)
    if n_pad != n:
        x = jnp.pad(x, ((0, n_pad - n), (0, 0)))
    grid = (n_pad // tile,)

    # --- VMEM budget ------------------------------------------------------
    # The (tile, cin) x block is lane-padded to 128 lanes in VMEM; both I/O
    # blocks are double-buffered.  Activations: a handful of (tile, 256) f32
    # temporaries live at once.  Cap at 48 MiB (safe on v7x's 64 MiB VMEM).
    param_bytes = sum(w.size * w.dtype.itemsize + b.size * b.dtype.itemsize
                      for w, b in kparams)
    io_bytes = 2 * tile * _LANE * 4 + 2 * tile * out_pad * 4
    act_bytes = 6 * tile * max(_HIDDEN) * 4
    est = io_bytes + param_bytes + act_bytes
    vmem_limit = int(min(48 * 2**20, max(32 * 2**20, int(1.5 * est))))

    args = [x]
    for w, b in kparams:
        args.append(w)
        args.append(b)

    def build_call(single_buffer_params):
        pkw = dict(pipeline_mode=pl.Buffered(1)) if single_buffer_params else {}
        in_specs = [pl.BlockSpec((tile, cin), lambda i: (i, 0))]
        for w, b in kparams:
            # Full-array parameter blocks; same block every grid step, so a
            # second pipeline buffer is dead weight.
            in_specs.append(pl.BlockSpec(w.shape, lambda i: (0, 0), **pkw))
            in_specs.append(pl.BlockSpec(b.shape, lambda i: (0, 0), **pkw))
        out_spec = pl.BlockSpec((tile, out_pad), lambda i: (i, 0))
        return pl.pallas_call(
            siren_kernel,
            out_shape=jax.ShapeDtypeStruct((n_pad, out_pad), jnp.float32),
            grid_spec=pltpu.PrefetchScalarGridSpec(
                num_scalar_prefetch=0,
                grid=grid,
                in_specs=in_specs,
                out_specs=out_spec,
            ),
            compiler_params=pltpu.CompilerParams(
                dimension_semantics=("parallel",),
                vmem_limit_bytes=vmem_limit,
            ),
        )

    try:
        out = build_call(True)(*args)
    except Exception:
        # Fallback if this JAX build rejects single-buffered parameter specs.
        out = build_call(False)(*args)
    return out[:n, :out_channels]


def siren_reference(x, params):
    h = x
    for i, (w_t, b) in enumerate(params):
        h = h @ w_t + b
        h = jnp.sin(h) if i < len(params) - 1 else jnp.maximum(h, 0.0)
    return h


if __name__ == "__main__":
    key = jax.random.PRNGKey(0)
    k_param, k_x = jax.random.split(key)

    in_channels, out_channels = 4, 4
    batch = 16

    params = init_siren_params(k_param, in_channels, out_channels)
    kparams, cout = prepare_params(params)
    x = jax.random.normal(k_x, (batch, in_channels), jnp.float32)

    out = siren_forward(x, kparams, cout)
    out = jax.block_until_ready(out)

    ref = siren_reference(x, params)
    assert out.shape == (batch, out_channels)
    # bf16 matmul operands + polynomial sin (<=5e-4 abs) -> relaxed tolerance.
    assert jnp.allclose(out, ref, atol=5e-2, rtol=5e-2), \
        float(jnp.max(jnp.abs(out - ref)))

    print("KERNEL_OK")
</pallas_src>

<mosaic_0001>
module attributes {stable_mosaic.version = 11 : i64} {
  func.func @siren_kernel(%arg0: i32, %arg1: memref<8x4xf32, #tpu.memory_space<vmem>>, %arg2: memref<4x128xf32, #tpu.memory_space<vmem>>, %arg3: memref<1x128xf32, #tpu.memory_space<vmem>>, %arg4: memref<128x256xbf16, #tpu.memory_space<vmem>>, %arg5: memref<1x256xf32, #tpu.memory_space<vmem>>, %arg6: memref<256x128xbf16, #tpu.memory_space<vmem>>, %arg7: memref<1x128xf32, #tpu.memory_space<vmem>>, %arg8: memref<128x128xbf16, #tpu.memory_space<vmem>>, %arg9: memref<1x128xf32, #tpu.memory_space<vmem>>, %arg10: memref<128x128xbf16, #tpu.memory_space<vmem>>, %arg11: memref<1x128xf32, #tpu.memory_space<vmem>>, %arg12: memref<8x128xf32, #tpu.memory_space<vmem>>) attributes {dimension_semantics = [#tpu.dimension_semantics<parallel>], iteration_bounds = array<i64: 2>, scalar_prefetch = 0 : i64, scratch_operands = 0 : i64, tpu.core_type = #tpu.core_type<tc>, window_params = [{transform_indices = @transform_0, window_bounds = array<i64: 8, 4>}, {pipeline_mode = #tpu.pipeline_mode<synchronous>, transform_indices = @transform_1, window_bounds = array<i64: 4, 128>}, {pipeline_mode = #tpu.pipeline_mode<synchronous>, transform_indices = @transform_2, window_bounds = array<i64: 1, 128>}, {pipeline_mode = #tpu.pipeline_mode<synchronous>, transform_indices = @transform_3, window_bounds = array<i64: 128, 256>}, {pipeline_mode = #tpu.pipeline_mode<synchronous>, transform_indices = @transform_4, window_bounds = array<i64: 1, 256>}, {pipeline_mode = #tpu.pipeline_mode<synchronous>, transform_indices = @transform_5, window_bounds = array<i64: 256, 128>}, {pipeline_mode = #tpu.pipeline_mode<synchronous>, transform_indices = @transform_6, window_bounds = array<i64: 1, 128>}, {pipeline_mode = #tpu.pipeline_mode<synchronous>, transform_indices = @transform_7, window_bounds = array<i64: 128, 128>}, {pipeline_mode = #tpu.pipeline_mode<synchronous>, transform_indices = @transform_8, window_bounds = array<i64: 1, 128>}, {pipeline_mode = #tpu.pipeline_mode<synchronous>, transform_indices = @transform_9, window_bounds = array<i64: 128, 128>}, {pipeline_mode = #tpu.pipeline_mode<synchronous>, transform_indices = @transform_10, window_bounds = array<i64: 1, 128>}, {transform_indices = @transform_11, window_bounds = array<i64: 8, 128>}]} {
    %c0 = arith.constant 0 : index
    %c0_0 = arith.constant 0 : index
    %0 = vector.load %arg1[%c0, %c0_0] : memref<8x4xf32, #tpu.memory_space<vmem>>, vector<8x4xf32>
    %c0_1 = arith.constant 0 : index
    %c0_2 = arith.constant 0 : index
    %1 = vector.load %arg2[%c0_1, %c0_2] : memref<4x128xf32, #tpu.memory_space<vmem>>, vector<4x128xf32>
    %c0_3 = arith.constant 0 : index
    %c0_4 = arith.constant 0 : index
    %2 = vector.load %arg3[%c0_3, %c0_4] : memref<1x128xf32, #tpu.memory_space<vmem>>, vector<1x128xf32>
    %3 = vector.shape_cast %2 : vector<1x128xf32> to vector<1x128xf32>
    %4 = vector.broadcast %3 : vector<1x128xf32> to vector<8x128xf32>
    %5 = vector.extract_strided_slice %0 {offsets = [0, 0], sizes = [8, 1], strides = [1, 1]} : vector<8x4xf32> to vector<8x1xf32>
    %6 = vector.extract_strided_slice %1 {offsets = [0, 0], sizes = [1, 128], strides = [1, 1]} : vector<4x128xf32> to vector<1x128xf32>
    %7 = vector.broadcast %5 : vector<8x1xf32> to vector<8x128xf32>
    %8 = vector.broadcast %6 : vector<1x128xf32> to vector<8x128xf32>
    %9 = arith.mulf %7, %8 : vector<8x128xf32>
    %10 = arith.addf %4, %9 : vector<8x128xf32>
    %11 = vector.extract_strided_slice %0 {offsets = [0, 1], sizes = [8, 1], strides = [1, 1]} : vector<8x4xf32> to vector<8x1xf32>
    %12 = vector.extract_strided_slice %1 {offsets = [1, 0], sizes = [1, 128], strides = [1, 1]} : vector<4x128xf32> to vector<1x128xf32>
    %13 = vector.broadcast %11 : vector<8x1xf32> to vector<8x128xf32>
    %14 = vector.broadcast %12 : vector<1x128xf32> to vector<8x128xf32>
    %15 = arith.mulf %13, %14 : vector<8x128xf32>
    %16 = arith.addf %10, %15 : vector<8x128xf32>
    %17 = vector.extract_strided_slice %0 {offsets = [0, 2], sizes = [8, 1], strides = [1, 1]} : vector<8x4xf32> to vector<8x1xf32>
    %18 = vector.extract_strided_slice %1 {offsets = [2, 0], sizes = [1, 128], strides = [1, 1]} : vector<4x128xf32> to vector<1x128xf32>
    %19 = vector.broadcast %17 : vector<8x1xf32> to vector<8x128xf32>
    %20 = vector.broadcast %18 : vector<1x128xf32> to vector<8x128xf32>
    %21 = arith.mulf %19, %20 : vector<8x128xf32>
    %22 = arith.addf %16, %21 : vector<8x128xf32>
    %23 = vector.extract_strided_slice %0 {offsets = [0, 3], sizes = [8, 1], strides = [1, 1]} : vector<8x4xf32> to vector<8x1xf32>
    %24 = vector.extract_strided_slice %1 {offsets = [3, 0], sizes = [1, 128], strides = [1, 1]} : vector<4x128xf32> to vector<1x128xf32>
    %25 = vector.broadcast %23 : vector<8x1xf32> to vector<8x128xf32>
    %26 = vector.broadcast %24 : vector<1x128xf32> to vector<8x128xf32>
    %27 = arith.mulf %25, %26 : vector<8x128xf32>
    %28 = arith.addf %22, %27 : vector<8x128xf32>
    %cst = arith.constant 0.159154937 : f32
    %29 = vector.broadcast %cst : f32 to vector<8x128xf32>
    %30 = arith.mulf %28, %29 : vector<8x128xf32>
    %cst_5 = arith.constant 5.000000e-01 : f32
    %31 = vector.broadcast %cst_5 : f32 to vector<8x128xf32>
    %32 = arith.addf %30, %31 : vector<8x128xf32>
    %33 = math.floor %32 : vector<8x128xf32>
    %cst_6 = arith.constant 6.28318548 : f32
    %34 = vector.broadcast %cst_6 : f32 to vector<8x128xf32>
    %35 = arith.mulf %33, %34 : vector<8x128xf32>
    %36 = arith.subf %28, %35 : vector<8x128xf32>
    %37 = arith.mulf %36, %36 : vector<8x128xf32>
    %cst_7 = arith.constant -2.50521079E-8 : f32
    %38 = vector.broadcast %cst_7 : f32 to vector<8x128xf32>
    %39 = arith.mulf %38, %37 : vector<8x128xf32>
    %cst_8 = arith.constant 2.75573188E-6 : f32
    %40 = vector.broadcast %cst_8 : f32 to vector<8x128xf32>
    %41 = arith.addf %39, %40 : vector<8x128xf32>
    %42 = arith.mulf %41, %37 : vector<8x128xf32>
    %cst_9 = arith.constant 1.98412701E-4 : f32
    %43 = vector.broadcast %cst_9 : f32 to vector<8x128xf32>
    %44 = arith.subf %42, %43 : vector<8x128xf32>
    %45 = arith.mulf %44, %37 : vector<8x128xf32>
    %cst_10 = arith.constant 0.00833333377 : f32
    %46 = vector.broadcast %cst_10 : f32 to vector<8x128xf32>
    %47 = arith.addf %45, %46 : vector<8x128xf32>
    %48 = arith.mulf %47, %37 : vector<8x128xf32>
    %cst_11 = arith.constant 0.166666672 : f32
    %49 = vector.broadcast %cst_11 : f32 to vector<8x128xf32>
    %50 = arith.subf %48, %49 : vector<8x128xf32>
    %51 = arith.mulf %50, %37 : vector<8x128xf32>
    %cst_12 = arith.constant 1.000000e+00 : f32
    %52 = vector.broadcast %cst_12 : f32 to vector<8x128xf32>
    %53 = arith.addf %51, %52 : vector<8x128xf32>
    %54 = arith.mulf %36, %53 : vector<8x128xf32>
    %55 = arith.truncf %54 : vector<8x128xf32> to vector<8x128xbf16>
    %c0_13 = arith.constant 0 : index
    %c0_14 = arith.constant 0 : index
    %56 = vector.load %arg4[%c0_13, %c0_14] : memref<128x256xbf16, #tpu.memory_space<vmem>>, vector<128x256xbf16>
    %cst_15 = arith.constant dense<0.000000e+00> : vector<8x256xf32>
    %57 = tpu.matmul %55, %56, %cst_15 {dimension_numbers = #tpu.dot_dimension_numbers<[1], [0], [0], [1], [0, 0, 1, 1], [], []>} : vector<8x128xbf16>, vector<128x256xbf16>, vector<8x256xf32> -> vector<8x256xf32>
    %c0_16 = arith.constant 0 : index
    %c0_17 = arith.constant 0 : index
    %58 = vector.load %arg5[%c0_16, %c0_17] : memref<1x256xf32, #tpu.memory_space<vmem>>, vector<1x256xf32>
    %59 = vector.broadcast %58 : vector<1x256xf32> to vector<8x256xf32>
    %60 = arith.addf %57, %59 : vector<8x256xf32>
    %cst_18 = arith.constant 0.159154937 : f32
    %61 = vector.broadcast %cst_18 : f32 to vector<8x256xf32>
    %62 = arith.mulf %60, %61 : vector<8x256xf32>
    %cst_19 = arith.constant 5.000000e-01 : f32
    %63 = vector.broadcast %cst_19 : f32 to vector<8x256xf32>
    %64 = arith.addf %62, %63 : vector<8x256xf32>
    %65 = math.floor %64 : vector<8x256xf32>
    %cst_20 = arith.constant 6.28318548 : f32
    %66 = vector.broadcast %cst_20 : f32 to vector<8x256xf32>
    %67 = arith.mulf %65, %66 : vector<8x256xf32>
    %68 = arith.subf %60, %67 : vector<8x256xf32>
    %69 = arith.mulf %68, %68 : vector<8x256xf32>
    %cst_21 = arith.constant -2.50521079E-8 : f32
    %70 = vector.broadcast %cst_21 : f32 to vector<8x256xf32>
    %71 = arith.mulf %70, %69 : vector<8x256xf32>
    %cst_22 = arith.constant 2.75573188E-6 : f32
    %72 = vector.broadcast %cst_22 : f32 to vector<8x256xf32>
    %73 = arith.addf %71, %72 : vector<8x256xf32>
    %74 = arith.mulf %73, %69 : vector<8x256xf32>
    %cst_23 = arith.constant 1.98412701E-4 : f32
    %75 = vector.broadcast %cst_23 : f32 to vector<8x256xf32>
    %76 = arith.subf %74, %75 : vector<8x256xf32>
    %77 = arith.mulf %76, %69 : vector<8x256xf32>
    %cst_24 = arith.constant 0.00833333377 : f32
    %78 = vector.broadcast %cst_24 : f32 to vector<8x256xf32>
    %79 = arith.addf %77, %78 : vector<8x256xf32>
    %80 = arith.mulf %79, %69 : vector<8x256xf32>
    %cst_25 = arith.constant 0.166666672 : f32
    %81 = vector.broadcast %cst_25 : f32 to vector<8x256xf32>
    %82 = arith.subf %80, %81 : vector<8x256xf32>
    %83 = arith.mulf %82, %69 : vector<8x256xf32>
    %cst_26 = arith.constant 1.000000e+00 : f32
    %84 = vector.broadcast %cst_26 : f32 to vector<8x256xf32>
    %85 = arith.addf %83, %84 : vector<8x256xf32>
    %86 = arith.mulf %68, %85 : vector<8x256xf32>
    %87 = arith.truncf %86 : vector<8x256xf32> to vector<8x256xbf16>
    %c0_27 = arith.constant 0 : index
    %c0_28 = arith.constant 0 : index
    %88 = vector.load %arg6[%c0_27, %c0_28] : memref<256x128xbf16, #tpu.memory_space<vmem>>, vector<256x128xbf16>
    %cst_29 = arith.constant dense<0.000000e+00> : vector<8x128xf32>
    %89 = tpu.matmul %87, %88, %cst_29 {dimension_numbers = #tpu.dot_dimension_numbers<[1], [0], [0], [1], [0, 0, 1, 1], [], []>} : vector<8x256xbf16>, vector<256x128xbf16>, vector<8x128xf32> -> vector<8x128xf32>
    %c0_30 = arith.constant 0 : index
    %c0_31 = arith.constant 0 : index
    %90 = vector.load %arg7[%c0_30, %c0_31] : memref<1x128xf32, #tpu.memory_space<vmem>>, vector<1x128xf32>
    %91 = vector.broadcast %90 : vector<1x128xf32> to vector<8x128xf32>
    %92 = arith.addf %89, %91 : vector<8x128xf32>
    %cst_32 = arith.constant 0.159154937 : f32
    %93 = vector.broadcast %cst_32 : f32 to vector<8x128xf32>
    %94 = arith.mulf %92, %93 : vector<8x128xf32>
    %cst_33 = arith.constant 5.000000e-01 : f32
    %95 = vector.broadcast %cst_33 : f32 to vector<8x128xf32>
    %96 = arith.addf %94, %95 : vector<8x128xf32>
    %97 = math.floor %96 : vector<8x128xf32>
    %cst_34 = arith.constant 6.28318548 : f32
    %98 = vector.broadcast %cst_34 : f32 to vector<8x128xf32>
    %99 = arith.mulf %97, %98 : vector<8x128xf32>
    %100 = arith.subf %92, %99 : vector<8x128xf32>
    %101 = arith.mulf %100, %100 : vector<8x128xf32>
    %cst_35 = arith.constant -2.50521079E-8 : f32
    %102 = vector.broadcast %cst_35 : f32 to vector<8x128xf32>
    %103 = arith.mulf %102, %101 : vector<8x128xf32>
    %cst_36 = arith.constant 2.75573188E-6 : f32
    %104 = vector.broadcast %cst_36 : f32 to vector<8x128xf32>
    %105 = arith.addf %103, %104 : vector<8x128xf32>
    %106 = arith.mulf %105, %101 : vector<8x128xf32>
    %cst_37 = arith.constant 1.98412701E-4 : f32
    %107 = vector.broadcast %cst_37 : f32 to vector<8x128xf32>
    %108 = arith.subf %106, %107 : vector<8x128xf32>
    %109 = arith.mulf %108, %101 : vector<8x128xf32>
    %cst_38 = arith.constant 0.00833333377 : f32
    %110 = vector.broadcast %cst_38 : f32 to vector<8x128xf32>
    %111 = arith.addf %109, %110 : vector<8x128xf32>
    %112 = arith.mulf %111, %101 : vector<8x128xf32>
    %cst_39 = arith.constant 0.166666672 : f32
    %113 = vector.broadcast %cst_39 : f32 to vector<8x128xf32>
    %114 = arith.subf %112, %113 : vector<8x128xf32>
    %115 = arith.mulf %114, %101 : vector<8x128xf32>
    %cst_40 = arith.constant 1.000000e+00 : f32
    %116 = vector.broadcast %cst_40 : f32 to vector<8x128xf32>
    %117 = arith.addf %115, %116 : vector<8x128xf32>
    %118 = arith.mulf %100, %117 : vector<8x128xf32>
    %119 = arith.truncf %118 : vector<8x128xf32> to vector<8x128xbf16>
    %c0_41 = arith.constant 0 : index
    %c0_42 = arith.constant 0 : index
    %120 = vector.load %arg8[%c0_41, %c0_42] : memref<128x128xbf16, #tpu.memory_space<vmem>>, vector<128x128xbf16>
    %cst_43 = arith.constant dense<0.000000e+00> : vector<8x128xf32>
    %121 = tpu.matmul %119, %120, %cst_43 {dimension_numbers = #tpu.dot_dimension_numbers<[1], [0], [0], [1], [0, 0, 1, 1], [], []>} : vector<8x128xbf16>, vector<128x128xbf16>, vector<8x128xf32> -> vector<8x128xf32>
    %c0_44 = arith.constant 0 : index
    %c0_45 = arith.constant 0 : index
    %122 = vector.load %arg9[%c0_44, %c0_45] : memref<1x128xf32, #tpu.memory_space<vmem>>, vector<1x128xf32>
    %123 = vector.broadcast %122 : vector<1x128xf32> to vector<8x128xf32>
    %124 = arith.addf %121, %123 : vector<8x128xf32>
    %cst_46 = arith.constant 0.159154937 : f32
    %125 = vector.broadcast %cst_46 : f32 to vector<8x128xf32>
    %126 = arith.mulf %124, %125 : vector<8x128xf32>
    %cst_47 = arith.constant 5.000000e-01 : f32
    %127 = vector.broadcast %cst_47 : f32 to vector<8x128xf32>
    %128 = arith.addf %126, %127 : vector<8x128xf32>
    %129 = math.floor %128 : vector<8x128xf32>
    %cst_48 = arith.constant 6.28318548 : f32
    %130 = vector.broadcast %cst_48 : f32 to vector<8x128xf32>
    %131 = arith.mulf %129, %130 : vector<8x128xf32>
    %132 = arith.subf %124, %131 : vector<8x128xf32>
    %133 = arith.mulf %132, %132 : vector<8x128xf32>
    %cst_49 = arith.constant -2.50521079E-8 : f32
    %134 = vector.broadcast %cst_49 : f32 to vector<8x128xf32>
    %135 = arith.mulf %134, %133 : vector<8x128xf32>
    %cst_50 = arith.constant 2.75573188E-6 : f32
    %136 = vector.broadcast %cst_50 : f32 to vector<8x128xf32>
    %137 = arith.addf %135, %136 : vector<8x128xf32>
    %138 = arith.mulf %137, %133 : vector<8x128xf32>
    %cst_51 = arith.constant 1.98412701E-4 : f32
    %139 = vector.broadcast %cst_51 : f32 to vector<8x128xf32>
    %140 = arith.subf %138, %139 : vector<8x128xf32>
    %141 = arith.mulf %140, %133 : vector<8x128xf32>
    %cst_52 = arith.constant 0.00833333377 : f32
    %142 = vector.broadcast %cst_52 : f32 to vector<8x128xf32>
    %143 = arith.addf %141, %142 : vector<8x128xf32>
    %144 = arith.mulf %143, %133 : vector<8x128xf32>
    %cst_53 = arith.constant 0.166666672 : f32
    %145 = vector.broadcast %cst_53 : f32 to vector<8x128xf32>
    %146 = arith.subf %144, %145 : vector<8x128xf32>
    %147 = arith.mulf %146, %133 : vector<8x128xf32>
    %cst_54 = arith.constant 1.000000e+00 : f32
    %148 = vector.broadcast %cst_54 : f32 to vector<8x128xf32>
    %149 = arith.addf %147, %148 : vector<8x128xf32>
    %150 = arith.mulf %132, %149 : vector<8x128xf32>
    %151 = arith.truncf %150 : vector<8x128xf32> to vector<8x128xbf16>
    %c0_55 = arith.constant 0 : index
    %c0_56 = arith.constant 0 : index
    %152 = vector.load %arg10[%c0_55, %c0_56] : memref<128x128xbf16, #tpu.memory_space<vmem>>, vector<128x128xbf16>
    %cst_57 = arith.constant dense<0.000000e+00> : vector<8x128xf32>
    %153 = tpu.matmul %151, %152, %cst_57 {dimension_numbers = #tpu.dot_dimension_numbers<[1], [0], [0], [1], [0, 0, 1, 1], [], []>} : vector<8x128xbf16>, vector<128x128xbf16>, vector<8x128xf32> -> vector<8x128xf32>
    %c0_58 = arith.constant 0 : index
    %c0_59 = arith.constant 0 : index
    %154 = vector.load %arg11[%c0_58, %c0_59] : memref<1x128xf32, #tpu.memory_space<vmem>>, vector<1x128xf32>
    %155 = vector.broadcast %154 : vector<1x128xf32> to vector<8x128xf32>
    %156 = arith.addf %153, %155 : vector<8x128xf32>
    %cst_60 = arith.constant 0.000000e+00 : f32
    %157 = vector.broadcast %cst_60 : f32 to vector<8x128xf32>
    %158 = arith.maximumf %156, %157 : vector<8x128xf32>
    %c0_61 = arith.constant 0 : index
    %c0_62 = arith.constant 0 : index
    %159 = vector.load %arg12[%c0_61, %c0_62] : memref<8x128xf32, #tpu.memory_space<vmem>>, vector<8x128xf32>
    tpu.vector_store %arg12[%c0_61, %c0_62], %158 {strides = array<i32>} : memref<8x128xf32, #tpu.memory_space<vmem>>, vector<8x128xf32>,
    return
  }
  func.func @transform_0(%arg0: i32) -> (i32, i32) {
    %c0_i32 = arith.constant 0 : i32
    %c0_i32_0 = arith.constant 0 : i32
    return %arg0, %c0_i32 : i32, i32
  }
  func.func @transform_1(%arg0: i32) -> (i32, i32) {
    %c0_i32 = arith.constant 0 : i32
    %c0_i32_0 = arith.constant 0 : i32
    %c0_i32_1 = arith.constant 0 : i32
    return %c0_i32, %c0_i32_0 : i32, i32
  }
  func.func @transform_2(%arg0: i32) -> (i32, i32) {
    %c0_i32 = arith.constant 0 : i32
    %c0_i32_0 = arith.constant 0 : i32
    %c0_i32_1 = arith.constant 0 : i32
    return %c0_i32, %c0_i32_0 : i32, i32
  }
  func.func @transform_3(%arg0: i32) -> (i32, i32) {
    %c0_i32 = arith.constant 0 : i32
    %c0_i32_0 = arith.constant 0 : i32
    %c0_i32_1 = arith.constant 0 : i32
    return %c0_i32, %c0_i32_0 : i32, i32
  }
  func.func @transform_4(%arg0: i32) -> (i32, i32) {
    %c0_i32 = arith.constant 0 : i32
    %c0_i32_0 = arith.constant 0 : i32
    %c0_i32_1 = arith.constant 0 : i32
    return %c0_i32, %c0_i32_0 : i32, i32
  }
  func.func @transform_5(%arg0: i32) -> (i32, i32) {
    %c0_i32 = arith.constant 0 : i32
    %c0_i32_0 = arith.constant 0 : i32
    %c0_i32_1 = arith.constant 0 : i32
    return %c0_i32, %c0_i32_0 : i32, i32
  }
  func.func @transform_6(%arg0: i32) -> (i32, i32) {
    %c0_i32 = arith.constant 0 : i32
    %c0_i32_0 = arith.constant 0 : i32
    %c0_i32_1 = arith.constant 0 : i32
    return %c0_i32, %c0_i32_0 : i32, i32
  }
  func.func @transform_7(%arg0: i32) -> (i32, i32) {
    %c0_i32 = arith.constant 0 : i32
    %c0_i32_0 = arith.constant 0 : i32
    %c0_i32_1 = arith.constant 0 : i32
    return %c0_i32, %c0_i32_0 : i32, i32
  }
  func.func @transform_8(%arg0: i32) -> (i32, i32) {
    %c0_i32 = arith.constant 0 : i32
    %c0_i32_0 = arith.constant 0 : i32
    %c0_i32_1 = arith.constant 0 : i32
    return %c0_i32, %c0_i32_0 : i32, i32
  }
  func.func @transform_9(%arg0: i32) -> (i32, i32) {
    %c0_i32 = arith.constant 0 : i32
    %c0_i32_0 = arith.constant 0 : i32
    %c0_i32_1 = arith.constant 0 : i32
    return %c0_i32, %c0_i32_0 : i32, i32
  }
  func.func @transform_10(%arg0: i32) -> (i32, i32) {
    %c0_i32 = arith.constant 0 : i32
    %c0_i32_0 = arith.constant 0 : i32
    %c0_i32_1 = arith.constant 0 : i32
    return %c0_i32, %c0_i32_0 : i32, i32
  }
  func.func @transform_11(%arg0: i32) -> (i32, i32) {
    %c0_i32 = arith.constant 0 : i32
    %c0_i32_0 = arith.constant 0 : i32
    return %arg0, %c0_i32 : i32, i32
  }
}

module attributes {stable_mosaic.version = 11 : i64} {
  func.func @siren_kernel(%arg0: i32, %arg1: memref<8x4xf32, #tpu.memory_space<vmem>>, %arg2: memref<4x128xf32, #tpu.memory_space<vmem>>, %arg3: memref<1x128xf32, #tpu.memory_space<vmem>>, %arg4: memref<128x256xbf16, #tpu.memory_space<vmem>>, %arg5: memref<1x256xf32, #tpu.memory_space<vmem>>, %arg6: memref<256x128xbf16, #tpu.memory_space<vmem>>, %arg7: memref<1x128xf32, #tpu.memory_space<vmem>>, %arg8: memref<128x128xbf16, #tpu.memory_space<vmem>>, %arg9: memref<1x128xf32, #tpu.memory_space<vmem>>, %arg10: memref<128x128xbf16, #tpu.memory_space<vmem>>, %arg11: memref<1x128xf32, #tpu.memory_space<vmem>>, %arg12: memref<8x128xf32, #tpu.memory_space<vmem>>) attributes {dimension_semantics = [#tpu.dimension_semantics<parallel>], iteration_bounds = array<i64: 2>, scalar_prefetch = 0 : i64, scratch_operands = 0 : i64, tpu.core_type = #tpu.core_type<tc>, window_params = [{transform_indices = @transform_0, window_bounds = array<i64: 8, 4>}, {pipeline_mode = #tpu.pipeline_mode<synchronous>, transform_indices = @transform_1, window_bounds = array<i64: 4, 128>}, {pipeline_mode = #tpu.pipeline_mode<synchronous>, transform_indices = @transform_2, window_bounds = array<i64: 1, 128>}, {pipeline_mode = #tpu.pipeline_mode<synchronous>, transform_indices = @transform_3, window_bounds = array<i64: 128, 256>}, {pipeline_mode = #tpu.pipeline_mode<synchronous>, transform_indices = @transform_4, window_bounds = array<i64: 1, 256>}, {pipeline_mode = #tpu.pipeline_mode<synchronous>, transform_indices = @transform_5, window_bounds = array<i64: 256, 128>}, {pipeline_mode = #tpu.pipeline_mode<synchronous>, transform_indices = @transform_6, window_bounds = array<i64: 1, 128>}, {pipeline_mode = #tpu.pipeline_mode<synchronous>, transform_indices = @transform_7, window_bounds = array<i64: 128, 128>}, {pipeline_mode = #tpu.pipeline_mode<synchronous>, transform_indices = @transform_8, window_bounds = array<i64: 1, 128>}, {pipeline_mode = #tpu.pipeline_mode<synchronous>, transform_indices = @transform_9, window_bounds = array<i64: 128, 128>}, {pipeline_mode = #tpu.pipeline_mode<synchronous>, transform_indices = @transform_10, window_bounds = array<i64: 1, 128>}, {transform_indices = @transform_11, window_bounds = array<i64: 8, 128>}]} {
    %c0 = arith.constant 0 : index
    %c0_0 = arith.constant 0 : index
    %0 = vector.load %arg1[%c0, %c0_0] : memref<8x4xf32, #tpu.memory_space<vmem>>, vector<8x4xf32>
    %c0_1 = arith.constant 0 : index
    %c0_2 = arith.constant 0 : index
    %1 = vector.load %arg2[%c0_1, %c0_2] : memref<4x128xf32, #tpu.memory_space<vmem>>, vector<4x128xf32>
    %c0_3 = arith.constant 0 : index
    %c0_4 = arith.constant 0 : index
    %2 = vector.load %arg3[%c0_3, %c0_4] : memref<1x128xf32, #tpu.memory_space<vmem>>, vector<1x128xf32>
    %3 = vector.shape_cast %2 : vector<1x128xf32> to vector<1x128xf32>
    %4 = vector.broadcast %3 : vector<1x128xf32> to vector<8x128xf32>
    %5 = vector.extract_strided_slice %0 {offsets = [0, 0], sizes = [8, 1], strides = [1, 1]} : vector<8x4xf32> to vector<8x1xf32>
    %6 = vector.extract_strided_slice %1 {offsets = [0, 0], sizes = [1, 128], strides = [1, 1]} : vector<4x128xf32> to vector<1x128xf32>
    %7 = vector.broadcast %5 : vector<8x1xf32> to vector<8x128xf32>
    %8 = vector.broadcast %6 : vector<1x128xf32> to vector<8x128xf32>
    %9 = arith.mulf %7, %8 : vector<8x128xf32>
    %10 = arith.addf %4, %9 : vector<8x128xf32>
    %11 = vector.extract_strided_slice %0 {offsets = [0, 1], sizes = [8, 1], strides = [1, 1]} : vector<8x4xf32> to vector<8x1xf32>
    %12 = vector.extract_strided_slice %1 {offsets = [1, 0], sizes = [1, 128], strides = [1, 1]} : vector<4x128xf32> to vector<1x128xf32>
    %13 = vector.broadcast %11 : vector<8x1xf32> to vector<8x128xf32>
    %14 = vector.broadcast %12 : vector<1x128xf32> to vector<8x128xf32>
    %15 = arith.mulf %13, %14 : vector<8x128xf32>
    %16 = arith.addf %10, %15 : vector<8x128xf32>
    %17 = vector.extract_strided_slice %0 {offsets = [0, 2], sizes = [8, 1], strides = [1, 1]} : vector<8x4xf32> to vector<8x1xf32>
    %18 = vector.extract_strided_slice %1 {offsets = [2, 0], sizes = [1, 128], strides = [1, 1]} : vector<4x128xf32> to vector<1x128xf32>
    %19 = vector.broadcast %17 : vector<8x1xf32> to vector<8x128xf32>
    %20 = vector.broadcast %18 : vector<1x128xf32> to vector<8x128xf32>
    %21 = arith.mulf %19, %20 : vector<8x128xf32>
    %22 = arith.addf %16, %21 : vector<8x128xf32>
    %23 = vector.extract_strided_slice %0 {offsets = [0, 3], sizes = [8, 1], strides = [1, 1]} : vector<8x4xf32> to vector<8x1xf32>
    %24 = vector.extract_strided_slice %1 {offsets = [3, 0], sizes = [1, 128], strides = [1, 1]} : vector<4x128xf32> to vector<1x128xf32>
    %25 = vector.broadcast %23 : vector<8x1xf32> to vector<8x128xf32>
    %26 = vector.broadcast %24 : vector<1x128xf32> to vector<8x128xf32>
    %27 = arith.mulf %25, %26 : vector<8x128xf32>
    %28 = arith.addf %22, %27 : vector<8x128xf32>
    %cst = arith.constant 0.159154937 : f32
    %29 = vector.broadcast %cst : f32 to vector<8x128xf32>
    %30 = arith.mulf %28, %29 : vector<8x128xf32>
    %cst_5 = arith.constant 5.000000e-01 : f32
    %31 = vector.broadcast %cst_5 : f32 to vector<8x128xf32>
    %32 = arith.addf %30, %31 : vector<8x128xf32>
    %33 = math.floor %32 : vector<8x128xf32>
    %cst_6 = arith.constant 6.28318548 : f32
    %34 = vector.broadcast %cst_6 : f32 to vector<8x128xf32>
    %35 = arith.mulf %33, %34 : vector<8x128xf32>
    %36 = arith.subf %28, %35 : vector<8x128xf32>
    %37 = arith.mulf %36, %36 : vector<8x128xf32>
    %cst_7 = arith.constant -2.50521079E-8 : f32
    %38 = vector.broadcast %cst_7 : f32 to vector<8x128xf32>
    %39 = arith.mulf %38, %37 : vector<8x128xf32>
    %cst_8 = arith.constant 2.75573188E-6 : f32
    %40 = vector.broadcast %cst_8 : f32 to vector<8x128xf32>
    %41 = arith.addf %39, %40 : vector<8x128xf32>
    %42 = arith.mulf %41, %37 : vector<8x128xf32>
    %cst_9 = arith.constant 1.98412701E-4 : f32
    %43 = vector.broadcast %cst_9 : f32 to vector<8x128xf32>
    %44 = arith.subf %42, %43 : vector<8x128xf32>
    %45 = arith.mulf %44, %37 : vector<8x128xf32>
    %cst_10 = arith.constant 0.00833333377 : f32
    %46 = vector.broadcast %cst_10 : f32 to vector<8x128xf32>
    %47 = arith.addf %45, %46 : vector<8x128xf32>
    %48 = arith.mulf %47, %37 : vector<8x128xf32>
    %cst_11 = arith.constant 0.166666672 : f32
    %49 = vector.broadcast %cst_11 : f32 to vector<8x128xf32>
    %50 = arith.subf %48, %49 : vector<8x128xf32>
    %51 = arith.mulf %50, %37 : vector<8x128xf32>
    %cst_12 = arith.constant 1.000000e+00 : f32
    %52 = vector.broadcast %cst_12 : f32 to vector<8x128xf32>
    %53 = arith.addf %51, %52 : vector<8x128xf32>
    %54 = arith.mulf %36, %53 : vector<8x128xf32>
    %55 = arith.truncf %54 : vector<8x128xf32> to vector<8x128xbf16>
    %c0_13 = arith.constant 0 : index
    %c0_14 = arith.constant 0 : index
    %56 = vector.load %arg4[%c0_13, %c0_14] : memref<128x256xbf16, #tpu.memory_space<vmem>>, vector<128x256xbf16>
    %cst_15 = arith.constant dense<0.000000e+00> : vector<8x256xf32>
    %57 = tpu.matmul %55, %56, %cst_15 {dimension_numbers = #tpu.dot_dimension_numbers<[1], [0], [0], [1], [0, 0, 1, 1], [], []>} : vector<8x128xbf16>, vector<128x256xbf16>, vector<8x256xf32> -> vector<8x256xf32>
    %c0_16 = arith.constant 0 : index
    %c0_17 = arith.constant 0 : index
    %58 = vector.load %arg5[%c0_16, %c0_17] : memref<1x256xf32, #tpu.memory_space<vmem>>, vector<1x256xf32>
    %59 = vector.broadcast %58 : vector<1x256xf32> to vector<8x256xf32>
    %60 = arith.addf %57, %59 : vector<8x256xf32>
    %cst_18 = arith.constant 0.159154937 : f32
    %61 = vector.broadcast %cst_18 : f32 to vector<8x256xf32>
    %62 = arith.mulf %60, %61 : vector<8x256xf32>
    %cst_19 = arith.constant 5.000000e-01 : f32
    %63 = vector.broadcast %cst_19 : f32 to vector<8x256xf32>
    %64 = arith.addf %62, %63 : vector<8x256xf32>
    %65 = math.floor %64 : vector<8x256xf32>
    %cst_20 = arith.constant 6.28318548 : f32
    %66 = vector.broadcast %cst_20 : f32 to vector<8x256xf32>
    %67 = arith.mulf %65, %66 : vector<8x256xf32>
    %68 = arith.subf %60, %67 : vector<8x256xf32>
    %69 = arith.mulf %68, %68 : vector<8x256xf32>
    %cst_21 = arith.constant -2.50521079E-8 : f32
    %70 = vector.broadcast %cst_21 : f32 to vector<8x256xf32>
    %71 = arith.mulf %70, %69 : vector<8x256xf32>
    %cst_22 = arith.constant 2.75573188E-6 : f32
    %72 = vector.broadcast %cst_22 : f32 to vector<8x256xf32>
    %73 = arith.addf %71, %72 : vector<8x256xf32>
    %74 = arith.mulf %73, %69 : vector<8x256xf32>
    %cst_23 = arith.constant 1.98412701E-4 : f32
    %75 = vector.broadcast %cst_23 : f32 to vector<8x256xf32>
    %76 = arith.subf %74, %75 : vector<8x256xf32>
    %77 = arith.mulf %76, %69 : vector<8x256xf32>
    %cst_24 = arith.constant 0.00833333377 : f32
    %78 = vector.broadcast %cst_24 : f32 to vector<8x256xf32>
    %79 = arith.addf %77, %78 : vector<8x256xf32>
    %80 = arith.mulf %79, %69 : vector<8x256xf32>
    %cst_25 = arith.constant 0.166666672 : f32
    %81 = vector.broadcast %cst_25 : f32 to vector<8x256xf32>
    %82 = arith.subf %80, %81 : vector<8x256xf32>
    %83 = arith.mulf %82, %69 : vector<8x256xf32>
    %cst_26 = arith.constant 1.000000e+00 : f32
    %84 = vector.broadcast %cst_26 : f32 to vector<8x256xf32>
    %85 = arith.addf %83, %84 : vector<8x256xf32>
    %86 = arith.mulf %68, %85 : vector<8x256xf32>
    %87 = arith.truncf %86 : vector<8x256xf32> to vector<8x256xbf16>
    %c0_27 = arith.constant 0 : index
    %c0_28 = arith.constant 0 : index
    %88 = vector.load %arg6[%c0_27, %c0_28] : memref<256x128xbf16, #tpu.memory_space<vmem>>, vector<256x128xbf16>
    %cst_29 = arith.constant dense<0.000000e+00> : vector<8x128xf32>
    %89 = tpu.matmul %87, %88, %cst_29 {dimension_numbers = #tpu.dot_dimension_numbers<[1], [0], [0], [1], [0, 0, 1, 1], [], []>} : vector<8x256xbf16>, vector<256x128xbf16>, vector<8x128xf32> -> vector<8x128xf32>
    %c0_30 = arith.constant 0 : index
    %c0_31 = arith.constant 0 : index
    %90 = vector.load %arg7[%c0_30, %c0_31] : memref<1x128xf32, #tpu.memory_space<vmem>>, vector<1x128xf32>
    %91 = vector.broadcast %90 : vector<1x128xf32> to vector<8x128xf32>
    %92 = arith.addf %89, %91 : vector<8x128xf32>
    %cst_32 = arith.constant 0.159154937 : f32
    %93 = vector.broadcast %cst_32 : f32 to vector<8x128xf32>
    %94 = arith.mulf %92, %93 : vector<8x128xf32>
    %cst_33 = arith.constant 5.000000e-01 : f32
    %95 = vector.broadcast %cst_33 : f32 to vector<8x128xf32>
    %96 = arith.addf %94, %95 : vector<8x128xf32>
    %97 = math.floor %96 : vector<8x128xf32>
    %cst_34 = arith.constant 6.28318548 : f32
    %98 = vector.broadcast %cst_34 : f32 to vector<8x128xf32>
    %99 = arith.mulf %97, %98 : vector<8x128xf32>
    %100 = arith.subf %92, %99 : vector<8x128xf32>
    %101 = arith.mulf %100, %100 : vector<8x128xf32>
    %cst_35 = arith.constant -2.50521079E-8 : f32
    %102 = vector.broadcast %cst_35 : f32 to vector<8x128xf32>
    %103 = arith.mulf %102, %101 : vector<8x128xf32>
    %cst_36 = arith.constant 2.75573188E-6 : f32
    %104 = vector.broadcast %cst_36 : f32 to vector<8x128xf32>
    %105 = arith.addf %103, %104 : vector<8x128xf32>
    %106 = arith.mulf %105, %101 : vector<8x128xf32>
    %cst_37 = arith.constant 1.98412701E-4 : f32
    %107 = vector.broadcast %cst_37 : f32 to vector<8x128xf32>
    %108 = arith.subf %106, %107 : vector<8x128xf32>
    %109 = arith.mulf %108, %101 : vector<8x128xf32>
    %cst_38 = arith.constant 0.00833333377 : f32
    %110 = vector.broadcast %cst_38 : f32 to vector<8x128xf32>
    %111 = arith.addf %109, %110 : vector<8x128xf32>
    %112 = arith.mulf %111, %101 : vector<8x128xf32>
    %cst_39 = arith.constant 0.166666672 : f32
    %113 = vector.broadcast %cst_39 : f32 to vector<8x128xf32>
    %114 = arith.subf %112, %113 : vector<8x128xf32>
    %115 = arith.mulf %114, %101 : vector<8x128xf32>
    %cst_40 = arith.constant 1.000000e+00 : f32
    %116 = vector.broadcast %cst_40 : f32 to vector<8x128xf32>
    %117 = arith.addf %115, %116 : vector<8x128xf32>
    %118 = arith.mulf %100, %117 : vector<8x128xf32>
    %119 = arith.truncf %118 : vector<8x128xf32> to vector<8x128xbf16>
    %c0_41 = arith.constant 0 : index
    %c0_42 = arith.constant 0 : index
    %120 = vector.load %arg8[%c0_41, %c0_42] : memref<128x128xbf16, #tpu.memory_space<vmem>>, vector<128x128xbf16>
    %cst_43 = arith.constant dense<0.000000e+00> : vector<8x128xf32>
    %121 = tpu.matmul %119, %120, %cst_43 {dimension_numbers = #tpu.dot_dimension_numbers<[1], [0], [0], [1], [0, 0, 1, 1], [], []>} : vector<8x128xbf16>, vector<128x128xbf16>, vector<8x128xf32> -> vector<8x128xf32>
    %c0_44 = arith.constant 0 : index
    %c0_45 = arith.constant 0 : index
    %122 = vector.load %arg9[%c0_44, %c0_45] : memref<1x128xf32, #tpu.memory_space<vmem>>, vector<1x128xf32>
    %123 = vector.broadcast %122 : vector<1x128xf32> to vector<8x128xf32>
    %124 = arith.addf %121, %123 : vector<8x128xf32>
    %cst_46 = arith.constant 0.159154937 : f32
    %125 = vector.broadcast %cst_46 : f32 to vector<8x128xf32>
    %126 = arith.mulf %124, %125 : vector<8x128xf32>
    %cst_47 = arith.constant 5.000000e-01 : f32
    %127 = vector.broadcast %cst_47 : f32 to vector<8x128xf32>
    %128 = arith.addf %126, %127 : vector<8x128xf32>
    %129 = math.floor %128 : vector<8x128xf32>
    %cst_48 = arith.constant 6.28318548 : f32
    %130 = vector.broadcast %cst_48 : f32 to vector<8x128xf32>
    %131 = arith.mulf %129, %130 : vector<8x128xf32>
    %132 = arith.subf %124, %131 : vector<8x128xf32>
    %133 = arith.mulf %132, %132 : vector<8x128xf32>
    %cst_49 = arith.constant -2.50521079E-8 : f32
    %134 = vector.broadcast %cst_49 : f32 to vector<8x128xf32>
    %135 = arith.mulf %134, %133 : vector<8x128xf32>
    %cst_50 = arith.constant 2.75573188E-6 : f32
    %136 = vector.broadcast %cst_50 : f32 to vector<8x128xf32>
    %137 = arith.addf %135, %136 : vector<8x128xf32>
    %138 = arith.mulf %137, %133 : vector<8x128xf32>
    %cst_51 = arith.constant 1.98412701E-4 : f32
    %139 = vector.broadcast %cst_51 : f32 to vector<8x128xf32>
    %140 = arith.subf %138, %139 : vector<8x128xf32>
    %141 = arith.mulf %140, %133 : vector<8x128xf32>
    %cst_52 = arith.constant 0.00833333377 : f32
    %142 = vector.broadcast %cst_52 : f32 to vector<8x128xf32>
    %143 = arith.addf %141, %142 : vector<8x128xf32>
    %144 = arith.mulf %143, %133 : vector<8x128xf32>
    %cst_53 = arith.constant 0.166666672 : f32
    %145 = vector.broadcast %cst_53 : f32 to vector<8x128xf32>
    %146 = arith.subf %144, %145 : vector<8x128xf32>
    %147 = arith.mulf %146, %133 : vector<8x128xf32>
    %cst_54 = arith.constant 1.000000e+00 : f32
    %148 = vector.broadcast %cst_54 : f32 to vector<8x128xf32>
    %149 = arith.addf %147, %148 : vector<8x128xf32>
    %150 = arith.mulf %132, %149 : vector<8x128xf32>
    %151 = arith.truncf %150 : vector<8x128xf32> to vector<8x128xbf16>
    %c0_55 = arith.constant 0 : index
    %c0_56 = arith.constant 0 : index
    %152 = vector.load %arg10[%c0_55, %c0_56] : memref<128x128xbf16, #tpu.memory_space<vmem>>, vector<128x128xbf16>
    %cst_57 = arith.constant dense<0.000000e+00> : vector<8x128xf32>
    %153 = tpu.matmul %151, %152, %cst_57 {dimension_numbers = #tpu.dot_dimension_numbers<[1], [0], [0], [1], [0, 0, 1, 1], [], []>} : vector<8x128xbf16>, vector<128x128xbf16>, vector<8x128xf32> -> vector<8x128xf32>
    %c0_58 = arith.constant 0 : index
    %c0_59 = arith.constant 0 : index
    %154 = vector.load %arg11[%c0_58, %c0_59] : memref<1x128xf32, #tpu.memory_space<vmem>>, vector<1x128xf32>
    %155 = vector.broadcast %154 : vector<1x128xf32> to vector<8x128xf32>
    %156 = arith.addf %153, %155 : vector<8x128xf32>
    %cst_60 = arith.constant 0.000000e+00 : f32
    %157 = vector.broadcast %cst_60 : f32 to vector<8x128xf32>
    %158 = arith.maximumf %156, %157 : vector<8x128xf32>
    %c0_61 = arith.constant 0 : index
    %c0_62 = arith.constant 0 : index
    %159 = vector.load %arg12[%c0_61, %c0_62] : memref<8x128xf32, #tpu.memory_space<vmem>>, vector<8x128xf32>
    tpu.vector_store %arg12[%c0_61, %c0_62], %158 {strides = array<i32>} : memref<8x128xf32, #tpu.memory_space<vmem>>, vector<8x128xf32>,
    return
  }
  func.func @transform_0(%arg0: i32) -> (i32, i32) {
    %c0_i32 = arith.constant 0 : i32
    %c0_i32_0 = arith.constant 0 : i32
    return %arg0, %c0_i32 : i32, i32
  }
  func.func @transform_1(%arg0: i32) -> (i32, i32) {
    %c0_i32 = arith.constant 0 : i32
    %c0_i32_0 = arith.constant 0 : i32
    %c0_i32_1 = arith.constant 0 : i32
    return %c0_i32, %c0_i32_0 : i32, i32
  }
  func.func @transform_2(%arg0: i32) -> (i32, i32) {
    %c0_i32 = arith.constant 0 : i32
    %c0_i32_0 = arith.constant 0 : i32
    %c0_i32_1 = arith.constant 0 : i32
    return %c0_i32, %c0_i32_0 : i32, i32
  }
  func.func @transform_3(%arg0: i32) -> (i32, i32) {
    %c0_i32 = arith.constant 0 : i32
    %c0_i32_0 = arith.constant 0 : i32
    %c0_i32_1 = arith.constant 0 : i32
    return %c0_i32, %c0_i32_0 : i32, i32
  }
  func.func @transform_4(%arg0: i32) -> (i32, i32) {
    %c0_i32 = arith.constant 0 : i32
    %c0_i32_0 = arith.constant 0 : i32
    %c0_i32_1 = arith.constant 0 : i32
    return %c0_i32, %c0_i32_0 : i32, i32
  }
  func.func @transform_5(%arg0: i32) -> (i32, i32) {
    %c0_i32 = arith.constant 0 : i32
    %c0_i32_0 = arith.constant 0 : i32
    %c0_i32_1 = arith.constant 0 : i32
    return %c0_i32, %c0_i32_0 : i32, i32
  }
  func.func @transform_6(%arg0: i32) -> (i32, i32) {
    %c0_i32 = arith.constant 0 : i32
    %c0_i32_0 = arith.constant 0 : i32
    %c0_i32_1 = arith.constant 0 : i32
    return %c0_i32, %c0_i32_0 : i32, i32
  }
  func.func @transform_7(%arg0: i32) -> (i32, i32) {
    %c0_i32 = arith.constant 0 : i32
    %c0_i32_0 = arith.constant 0 : i32
    %c0_i32_1 = arith.constant 0 : i32
    return %c0_i32, %c0_i32_0 : i32, i32
  }
  func.func @transform_8(%arg0: i32) -> (i32, i32) {
    %c0_i32 = arith.constant 0 : i32
    %c0_i32_0 = arith.constant 0 : i32
    %c0_i32_1 = arith.constant 0 : i32
    return %c0_i32, %c0_i32_0 : i32, i32
  }
  func.func @transform_9(%arg0: i32) -> (i32, i32) {
    %c0_i32 = arith.constant 0 : i32
    %c0_i32_0 = arith.constant 0 : i32
    %c0_i32_1 = arith.constant 0 : i32
    return %c0_i32, %c0_i32_0 : i32, i32
  }
  func.func @transform_10(%arg0: i32) -> (i32, i32) {
    %c0_i32 = arith.constant 0 : i32
    %c0_i32_0 = arith.constant 0 : i32
    %c0_i32_1 = arith.constant 0 : i32
    return %c0_i32, %c0_i32_0 : i32, i32
  }
  func.func @transform_11(%arg0: i32) -> (i32, i32) {
    %c0_i32 = arith.constant 0 : i32
    %c0_i32_0 = arith.constant 0 : i32
    return %arg0, %c0_i32 : i32, i32
  }
}

</mosaic_0001>

<bundles_post_ra>
// kernel: tpu_custom_call.1
= control target key start
LH: loop header
LB: loop body
LE: loop exit
PB: predicated region body
PF: predicated region fallthrough
CT: control target
= control target key end

     0   :  { %s2096_s0 = inlined_call_operand.vmem [shape: f32[16,4], index: 0, kind: input, shape index: {}]   ;;  %s2097_s1 = inlined_call_operand.vmem [shape: f32[4,128], index: 1, kind: input, shape index: {}]   ;;  %s2098_s2 = inlined_call_operand.vmem [shape: f32[1,128], index: 2, kind: input, shape index: {}]   ;;  %s2099_s3 = inlined_call_operand.hbm [shape: bf16[128,256], index: 3, kind: input, shape index: {}]   ;;  %s2100_s4 = inlined_call_operand.vmem [shape: f32[1,256], index: 4, kind: input, shape index: {}]   ;;  %s2101_s5 = inlined_call_operand.hbm [shape: bf16[256,128], index: 5, kind: input, shape index: {}]   ;;  %s2102_s6 = inlined_call_operand.vmem [shape: f32[1,128], index: 6, kind: input, shape index: {}]   ;;  %s2103_s7 = inlined_call_operand.hbm [shape: bf16[128,128], index: 7, kind: input, shape index: {}]   ;;  %s2104_s8 = inlined_call_operand.vmem [shape: f32[1,128], index: 8, kind: input, shape index: {}]   ;;  %s2105_s9 = inlined_call_operand.hbm [shape: bf16[128,128], index: 9, kind: input, shape index: {}]   ;;  %s2106_s10 = inlined_call_operand.vmem [shape: f32[1,128], index: 10, kind: input, shape index: {}]   ;;  %s2107_s11 = inlined_call_operand.hbm [shape: f32[16,128], index: 11, kind: output, shape index: {}]  }
   0x1   :  { %2121 = sst [smem:[#allocation21_spill]] %s2101_s5 }
   0x2   :  { %16 = vsyncpa [#allocation3], 0 }
   0x3   :  { %17 = vsyncpa [#allocation6], 0 }
   0x4   :  { %18 = vsyncpa [#allocation9], 0 }
   0x5   :  { %19 = vsyncpa [#allocation4], 0 }
   0x6   :  { %21 = vsyncpa [#allocation4 + $0x1], 0  ;;  %s1818_s17 = smov 0   ;;  %s1820_s18 = smov 0  }
   0x7   :  { %s1822_s19 = smov 0   ;;  %s1824_s20 = smov 0  }
   0x8 LB: > { %2122 = sst [smem:[#allocation15_spill]] %s1729_s17  ;;  %s1839_s21 = sadd.s32 4294967295, %s1741_s20   ;;  %s1741_s20 = sphi %s1824_s20, %s2148_s20   ;;  %s1737_s19 = sphi %s1822_s19, %s2150_s19   ;;  %s1733_s18 = sphi %s1820_s18, %s2152_s18   ;;  %s1729_s17 = sphi %s1818_s17, %s2151_s17  }
   0x9   : > { %2123 = sst [smem:[#allocation16_spill]] %s1737_s19  ;;  %s1244_s22 = sadd.s32 4294967294, %s1741_s20  }
   0xa   : > { %2124 = sst [smem:[#allocation17_spill]] %s1741_s20  ;;  %s1843_s23 = sadd.s32 1, %s1741_s20  }
   0xb   : > { %2125 = sst [smem:[#allocation18_spill]] %s1843_s23  ;;  %s270_s24 = sadd.s32 1, %s1737_s19 }
   0xc   : > { %s267_s25 = ssub.s32 %s1741_s20, %s1843_s23  ;;  %p280_p0 = scmp.ne.s32.totalorder %s1737_s19, %s1733_s18 }
   0xd   : > { %p268_p1 = scmp.eq.s32.totalorder %s267_s25, 0  ;;  %p281_p2 = scmp.eq.s32.totalorder %s1839_s21, 1 }
   0xe   : > { %p286_p3 = scmp.ne.s32.totalorder %s1733_s18, %s1729_s17  ;;  %p287_p4 = scmp.eq.s32.totalorder %s1244_s22, 1 }
   0xf   : > { %s1854_s26 = scalar_select %p268_p1, %s1737_s19, %s270_s24  }
  0x10   : > { %p1856_p5 = por %p281_p2, %p280_p0  ;;  %p1860_p6 = por %p287_p4, %p286_p3 }
  0x11   : > { %2126 = sst [smem:[#allocation19_spill]] %s1854_s26  ;;  %p1245_p7 = scmp.ge.s32.totalorder %s1741_s20, 1 }
  0x12   : > { %s2127_s27 = scalar_select %p1856_p5, 1, 0 }
  0x13   : > { %s2128_s28 = scalar_select %p1860_p6, 1, 0 }
  0x14   : > { %p294_p8 = scmp.lt.s32.totalorder %s1741_s20, 3  ;;  %p2109_p9 = scmp.eq.s32.totalorder %s1839_s21, 0 }
  0x15   : > { %2129 = sst [smem:[#allocation20_spill]] %s2128_s28  ;;  %s1743_s30 = smov [#allocation5]  }
  0x16   : > { %p1867_p10 = pnand %p1245_p7, %p294_p8  ;;  %s328_s12 = sshll.u32 %s1743_s30, 4  ;;  %s329_s12 = int_to_ptr.vmem [resolvable:$true] %s328_s12 }
  0x17   : > { %s1744_s14 = smov [#allocation2]   ;;  %s2132_s5 = sld [smem:[#allocation21_spill]] }
  0x18   : > { %s2130_s29 = scalar_select %p1867_p10, 1, 0 }
  0x19   : > { %p1422_p11 = pneg %p1867_p10  ;;  %s312_s15 = sshll.u32 %s1744_s14, 4  ;;  %s1879_s15 = int_to_ptr.vmem [resolvable:$true] %s312_s15 }
  0x1b   : > { %p1875_p12 = pnand %p2109_p9, %p1422_p11 }
  0x1d   : > { %s1555_s24 = scalar_lea.hbm %s2132_s5, 2048  ;;  %p1889_p0 = pneg %p1875_p12 }
  0x1e   : > { %p1556_p13 = scmp.ne.s32.totalorder %s2132_s5, %s1555_s24  ;;  %p1562_p3 = scmp.lt.u32.totalorder %s1555_s24, %s2132_s5 }
  0x20   : > { %p1558_p1 = pnand %p1889_p0, %p1556_p13 }
  0x22   : > { %p1559_p2 = pneg %p1558_p1 }
  0x24   : > { %p1564_p4 = pnand %p1562_p3, %p1559_p2 }
  0x26   : > { %1567 = shalt.err (!%p1564_p4)
}
  0x27   : > { %s1568_s16 = scalar_lea.vmem %s329_s12, 2048  ;;  %p1576_p9 = scmp.lt.s32.totalorder %s329_s12, %s329_s12 }
  0x28   : > { %p1569_p7 = scmp.ne.s32.totalorder %s329_s12, %s1568_s16  ;;  %p1577_p6 = scmp.lt.s32.totalorder %s1568_s16, %s1568_s16 }
  0x2a   : > { %p1571_p8 = pnand %p1569_p7, %p1889_p0  ;;  %p1578_p5 = por %p1577_p6, %p1576_p9 }
  0x2c   : > { %p1572_p11 = pneg %p1571_p8 }
  0x2e   : > { %p1579_p10 = pnand %p1578_p5, %p1572_p11 }
  0x30   : > { %1582 = shalt.err (!%p1579_p10)
}
  0x31   : > { %s2117_s26 = smov 64   ;;  %s2119_s22 = smov 4  }
  0x32   : > { %1428 = dma.hbm_to_vmem [thread:$0]  (!%p1875_p12), %s2132_s5, 2048, %s329_s12, [#allocation6], %s2117_s26, %s2117_s26, %s2119_s22  }
  0x33   : > { %s1583_s23 = scalar_lea.hbm %s2099_s3, 2048 }
  0x34   : > { %p1584_p5 = scmp.ne.s32.totalorder %s2099_s3, %s1583_s23  ;;  %p1590_p10 = scmp.lt.u32.totalorder %s1583_s23, %s2099_s3 }
  0x36   : > { %p1586_p6 = pnand %p1584_p5, %p1889_p0 }
  0x38   : > { %p1587_p9 = pneg %p1586_p6 }
  0x3a   : > { %p1592_p13 = pnand %p1590_p10, %p1587_p9 }
  0x3c   : > { %1595 = shalt.err (!%p1592_p13)
}
  0x3d   : > { %s1596_s12 = scalar_lea.vmem %s1879_s15, 2048  ;;  %p1604_p4 = scmp.lt.s32.totalorder %s1879_s15, %s1879_s15 }
  0x3e   : > { %p1597_p1 = scmp.ne.s32.totalorder %s1879_s15, %s1596_s12  ;;  %p1605_p7 = scmp.lt.s32.totalorder %s1596_s12, %s1596_s12 }
  0x40   : > { %p1599_p2 = pnand %p1597_p1, %p1889_p0  ;;  %p1606_p8 = por %p1605_p7, %p1604_p4 }
  0x42   : > { %p1600_p3 = pneg %p1599_p2 }
  0x44   : > { %p1607_p11 = pnand %p1606_p8, %p1600_p3 }
  0x46   : > { %1610 = shalt.err (!%p1607_p11)
}
  0x47   : > { %s1747_s28 = smov 128   ;;  %s1748_s17 = smov 8  }
  0x48   : > { %1425 = dma.hbm_to_vmem [thread:$0]  (!%p1875_p12), %s2099_s3, 2048, %s1879_s15, [#allocation3], %s1747_s28, %s1747_s28, %s1748_s17  }
  0x49   : > { %s1749_s19 = smov [#allocation7]   ;;  %s1750_s25 = smov [#allocation8]  }
  0x4a   : > { %s344_s24 = sshll.u32 %s1749_s19, 4  ;;  %s360_s14 = sshll.u32 %s1750_s25, 4  ;;  %s345_s24 = int_to_ptr.vmem [resolvable:$true] %s344_s24  ;;  %s1931_s14 = int_to_ptr.vmem [resolvable:$true] %s360_s14 }
  0x4b   : > { %s1611_s26 = scalar_lea.hbm %s2103_s7, 1024 }
  0x4c   : > { %p1612_p5 = scmp.ne.s32.totalorder %s2103_s7, %s1611_s26  ;;  %p1618_p10 = scmp.lt.u32.totalorder %s1611_s26, %s2103_s7 }
  0x4e   : > { %p1614_p6 = pnand %p1612_p5, %p1889_p0 }
  0x50   : > { %p1615_p9 = pneg %p1614_p6 }
  0x52   : > { %p1620_p13 = pnand %p1618_p10, %p1615_p9 }
  0x54   : > { %1623 = shalt.err (!%p1620_p13)
}
  0x55   : > { %s1624_s28 = scalar_lea.vmem %s345_s24, 1024  ;;  %p1632_p4 = scmp.lt.s32.totalorder %s345_s24, %s345_s24 }
  0x56   : > { %p1625_p1 = scmp.ne.s32.totalorder %s345_s24, %s1624_s28  ;;  %p1633_p7 = scmp.lt.s32.totalorder %s1624_s28, %s1624_s28 }
  0x58   : > { %p1627_p2 = pnand %p1625_p1, %p1889_p0  ;;  %p1634_p8 = por %p1633_p7, %p1632_p4 }
  0x5a   : > { %p1628_p3 = pneg %p1627_p2 }
  0x5c   : > { %p1635_p11 = pnand %p1634_p8, %p1628_p3 }
  0x5e   : > { %1638 = shalt.err (!%p1635_p11)
}
  0x5f   : > { %s2134_s5 = smov 4   ;;  %s2135_s22 = smov 64  }
  0x60   : > { %1431 = dma.hbm_to_vmem [thread:$0]  (!%p1875_p12), %s2103_s7, 1024, %s345_s24, [#allocation6], %s2135_s22, %s2135_s22, %s2134_s5  }
  0x61   : > { %s1639_s25 = scalar_lea.hbm %s2105_s9, 1024 }
  0x62   : > { %p1640_p5 = scmp.ne.s32.totalorder %s2105_s9, %s1639_s25  ;;  %p1646_p10 = scmp.lt.u32.totalorder %s1639_s25, %s2105_s9 }
  0x64   : > { %p1642_p6 = pnand %p1640_p5, %p1889_p0 }
  0x66   : > { %p1643_p9 = pneg %p1642_p6 }
  0x68   : > { %p1648_p13 = pnand %p1646_p10, %p1643_p9 }
  0x6a   : > { %1651 = shalt.err (!%p1648_p13)
}
  0x6b   : > { %s1652_s24 = scalar_lea.vmem %s1931_s14, 1024  ;;  %p1660_p4 = scmp.lt.s32.totalorder %s1931_s14, %s1931_s14 }
  0x6c   : > { %p1653_p1 = scmp.ne.s32.totalorder %s1931_s14, %s1652_s24  ;;  %p1661_p7 = scmp.lt.s32.totalorder %s1652_s24, %s1652_s24 }
  0x6e   : > { %p1655_p2 = pnand %p1653_p1, %p1889_p0  ;;  %p1662_p8 = por %p1661_p7, %p1660_p4 }
  0x70   : > { %p1656_p3 = pneg %p1655_p2 }
  0x72   : > { %p1663_p11 = pnand %p1662_p8, %p1656_p3 }
  0x74   : > { %1666 = shalt.err (!%p1663_p11)
}
  0x75   : > { %1434 = dma.hbm_to_vmem [thread:$0]  (!%p1875_p12), %s2105_s9, 1024, %s1931_s14, [#allocation9], %s2135_s22, %s2135_s22, %s2134_s5  }
  0x76   : > { %p2136_p5 = scmp.ne.s32.totalorder %s2130_s29, 0 }
  0x77   : > { %p2137_p0 = scmp.eq.s32.totalorder (!%p2136_p5), %s1839_s21, 0 }
  0x78   : > { %386 = sbr.rel (%p2136_p5) target bundleno = 1303 (0x517), region = 64 }
  0x7f   : > { %1712 = dma.done.wait (%p2137_p0), [#allocation3], 2048   ;;  %p2138_p6 = pmov %p2137_p0 }
  0x80   : > { %p2139_p9 = pmov %p2137_p0 }
  0x81   : > { %1714 = vsyncadd (%p2138_p6), [#allocation3], 4294965248 }
  0x82   : > { %1716 = dma.done.wait (%p2139_p9), [#allocation6], 3072   ;;  %p2140_p10 = pmov %p2137_p0 }
  0x83   : > { %p2141_p13 = pmov %p2137_p0 }
  0x84   : > { %1718 = vsyncadd (%p2140_p10), [#allocation6], 4294964224 }
  0x85   : > { %1720 = dma.done.wait (%p2141_p13), [#allocation9], 1024   ;;  %p2142_p12 = pmov %p2137_p0 }
  0x86   : > { %p437_p1 = scmp.lt.s32.totalorder %s1839_s21, 1  ;;  %v1751_v0 = vmov 0   ;;  %v1752_v1 = vmov 2   ;;  %v1753_v3 = vmov 1   ;;  %v1754_v4 = vmov 3   ;;  %v1523_v63 = vld [vmem:[#allocation5 + $0x40] sm:$0xff]  }
  0x87   : > { %1722 = vsyncadd (%p2142_p12), [#allocation9], 4294966272  ;;  %1494 = vset.pattern.permute.xlu0 %v1751_v0  ;;  %1496 = vset.pattern.permute.xlu1 %v1752_v1  ;;  %v1499_v5 = vld [vmem:[#allocation2 + $0x4] ss:$8 sps:$4 sm:$0xff]   ;;  %v1501_v6 = vld [vmem:[#allocation2] ss:$8 sps:$4 sm:$0xff]   ;;  %v456_v21 = vlaneseq }
  0x88   : > { %s438_s29 = scalar_select %p437_p1, %s1839_s21, 1  ;;  %650 = vmatprep.mubr.bf16.mxu0 %v1751_v0  ;;  %618 = vmatprep.subr.bf16.mxu0 %v1499_v5  ;;  %v1502_v7 = vld [vmem:[#allocation2 + $0x14] ss:$8 sps:$4 sm:$0xff]   ;;  %v1504_v8 = vld [vmem:[#allocation2 + $0x10] ss:$8 sps:$4 sm:$0xff]   ;;  %v1524_v0 = vld [vmem:[#allocation5] sm:$0xff]  }
  0x89   : > { %619 = vmatpush1.bf16.msra.mxu0 %v1501_v6  ;;  %v1505_v9 = vld [vmem:[#allocation2 + $0x24] ss:$8 sps:$4 sm:$0xff]   ;;  %v1507_v10 = vld [vmem:[#allocation2 + $0x20] ss:$8 sps:$4 sm:$0xff]   ;;  %v1508_v11 = vld [vmem:[#allocation2 + $0x34] ss:$8 sps:$4 sm:$0xff]   ;;  %1324 = vmatprep.subr.bf16.mxu1 %v1523_v63 }
  0x8a   : > { %s1257_s13 = sshll.u32 %s438_s29, 3  ;;  %620 = vmatprep.subr.bf16.mxu0 %v1502_v7  ;;  %v1510_v12 = vld [vmem:[#allocation2 + $0x30] ss:$8 sps:$4 sm:$0xff]   ;;  %v1511_v13 = vld [vmem:[#allocation2 + $0x44] ss:$8 sps:$4 sm:$0xff]   ;;  %v1999_v22 = vshrl.u32 %v456_v21, 7  ;;  %1325 = vmatpush3.bf16.msra.mxu1 %v1524_v0 }
  0x8b   : > { %s440_s5 = scalar_lea.vmem %s2096_s0, %s1257_s13  ;;  %v1513_v14 = vld [vmem:[#allocation2 + $0x40] ss:$8 sps:$4 sm:$0xff]   ;;  %v1514_v15 = vld [vmem:[#allocation2 + $0x54] ss:$8 sps:$4 sm:$0xff]   ;;  %v1516_v16 = vld [vmem:[#allocation2 + $0x50] ss:$8 sps:$4 sm:$0xff]  }
  0x8c   : > { %v442_v2 = vld [vmem:[%s440_s5] sm:$0xff]  ;;  %v1520_v19 = vld [vmem:[#allocation2 + $0x74] ss:$8 sps:$4 sm:$0xff]   ;;  %v1522_v20 = vld [vmem:[#allocation2 + $0x70] ss:$8 sps:$4 sm:$0xff]   ;;  %v458_v23 = vsub.s32 0, %v1999_v22 }
  0x8d   : > { %453 = vperm.xlu0 %1494, %v442_v2   ;;  %473 = vperm.xlu1 %1496, %v442_v2   ;;  %v1517_v17 = vld [vmem:[#allocation2 + $0x64] ss:$8 sps:$4 sm:$0xff]   ;;  %v1519_v18 = vld [vmem:[#allocation2 + $0x60] ss:$8 sps:$4 sm:$0xff]   ;;  %v468_v26 = vsub.s32 1, %v1999_v22  ;;  %v478_v28 = vsub.s32 2, %v1999_v22 }
  0x8e   : > { %621 = vmatpush1.bf16.msra.mxu0 %v1504_v8  ;;  %v443_v24 = vld [vmem:[%s2097_s1] sm:$0xf]  ;;  %v488_v30 = vsub.s32 3, %v1999_v22  ;;  %v1529_v5 = vld [vmem:[#allocation5 + $0x58] sm:$0xff]   ;;  %v1531_v7 = vld [vmem:[#allocation5 + $0x60] sm:$0xff]   ;;  %vm1756_vm0 = vmmov 0  }
  0x8f   : > { %622 = vmatprep.subr.bf16.mxu0 %v1505_v9  ;;  %v459_v25 = vrot.slane %v443_v24, %v458_v23  ;;  %v469_v32 = vrot.slane %v443_v24, %v468_v26  ;;  %v1258_v33 = vld [vmem:[%s2098_s2] ss:$0 sm:$0xff]  ;;  %v479_v34 = vrot.slane %v443_v24, %v478_v28  ;;  %v1530_v6 = vld [vmem:[#allocation5 + $0x18] sm:$0xff]   ;;  %v1532_v8 = vld [vmem:[#allocation5 + $0x20] sm:$0xff]   ;;  %s434_s28 = sand.u32 1, %s1733_s18   ;;  %s1321_s30 = sshll.u32 %s1839_s21, 7 }
  0x90   : > { %v489_v35 = vrot.slane %v443_v24, %v488_v30  ;;  %v1525_v1 = vld [vmem:[#allocation5 + $0x48] sm:$0xff]   ;;  %v1541_v63 = vld [vmem:[#allocation7 + $0x10] sm:$0xff]   ;;  %v1542_v0 = vld [vmem:[#allocation7 + $0x18] sm:$0xff]   ;;  %s1256_s17 = sshll.u32 %s434_s28, 3  ;;  %s2054_s23 = scalar_lea.hbm %s2107_s11, %s1321_s30 }
  0x91   : > { %1495 = vset.pattern.permute.xlu0 %v1753_v3  ;;  %1497 = vset.pattern.permute.xlu1 %v1754_v4  ;;  %v1527_v3 = vld [vmem:[#allocation5 + $0x50] sm:$0xff]   ;;  %v1533_v9 = vld [vmem:[#allocation5 + $0x68] sm:$0xff]   ;;  %s436_s14 = scalar_lea.vmem [#allocation10], %s1256_s17  ;;  %s1131_s19 = scalar_lea.sflag [#allocation4], %s434_s28 }
  0x92   : > { %463 = vperm.xlu0 %1495, %v442_v2   ;;  %483 = vperm.xlu1 %1497, %v442_v2   ;;  %v1526_v2 = vld [vmem:[#allocation5 + $0x8] sm:$0xff]   ;;  %s1144_s5 = sshll.u32 %s436_s14, 4  ;;  %p2143_p3 = scmp.ne.s32.totalorder %s2127_s27, 0  ;;  %s2056_s5 = int_to_ptr.vmem [resolvable:$true] %s1144_s5 }
  0x93   : > { %623 = vmatpush1.bf16.msra.mxu0 %v1507_v10  ;;  %1326 = vmatprep.subr.bf16.mxu1 %v1525_v1  ;;  %v1534_v10 = vld [vmem:[#allocation5 + $0x28] sm:$0xff]   ;;  %v1543_v1 = vld [vmem:[#allocation7 + $0x20] sm:$0xff]   ;;  %s1667_s21 = scalar_lea.vmem %s2056_s5, 128  ;;  %s1757_s25 = smov [#allocation10]  }
  0x94   : > { %624 = vmatprep.subr.bf16.mxu0 %v1508_v11  ;;  %1327 = vmatpush3.bf16.msra.mxu1 %v1526_v2  ;;  %v1535_v11 = vld [vmem:[#allocation5 + $0x70] sm:$0xff]   ;;  %v1544_v2 = vld [vmem:[#allocation7 + $0x28] sm:$0xff]   ;;  %p1668_p2 = scmp.ne.s32.totalorder %s2056_s5, %s1667_s21  ;;  %s1671_s16 = sshll.u32 %s1757_s25, 4  ;;  %s1672_s16 = int_to_ptr.vmem [resolvable:$false] %s1671_s16 }
  0x95   : > { %1328 = vmatprep.subr.bf16.mxu1 %v1527_v3  ;;  %v1545_v3 = vld [vmem:[#allocation7 + $0x30] sm:$0xff]   ;;  %s1673_s12 = scalar_lea.vmem %s1672_s16, 256  ;;  %p1674_p8 = scmp.lt.s32.totalorder %s2056_s5, %s1672_s16 }
  0x96   : > { %1498 = vset.pattern.permute.xlu0 %v1754_v4  ;;  %v1528_v4 = vld [vmem:[#allocation5 + $0x10] sm:$0xff]   ;;  %p1669_p4 = pnand %p1668_p2, %p2143_p3  ;;  %p1675_p11 = scmp.lt.s32.totalorder %s1673_s12, %s1667_s21 }
  0x97   : > { %625 = vmatpush1.bf16.msra.mxu0 %v1510_v12  ;;  %v1536_v12 = vld [vmem:[#allocation5 + $0x30] sm:$0xff]  }
  0x98   : > { %626 = vmatprep.subr.bf16.mxu0 %v1511_v13  ;;  %1329 = vmatpush3.bf16.msra.mxu1 %v1528_v4  ;;  %v1537_v13 = vld [vmem:[#allocation5 + $0x78] sm:$0xff]   ;;  %p1670_p7 = pneg %p1669_p4  ;;  %p1676_p5 = por %p1675_p11, %p1674_p8 }
  0x99   : > { %1330 = vmatprep.subr.bf16.mxu1 %v1529_v5  ;;  %v1546_v4 = vld [vmem:[#allocation7 + $0x38] sm:$0xff]  }
  0x9a   : > { %p1677_p0 = pnand %p1676_p5, %p1670_p7 }
  0x9b   : > { %627 = vmatpush1.bf16.msra.mxu0 %v1513_v14  ;;  %v1538_v14 = vld [vmem:[#allocation5 + $0x38] sm:$0xff]  }
  0x9c   : > { %628 = vmatprep.subr.bf16.mxu0 %v1514_v15  ;;  %1331 = vmatpush3.bf16.msra.mxu1 %v1530_v6  ;;  %v526_v15 = vld [vmem:[%s2100_s4] sm:$0x3] }
  0x9d   : > { %1332 = vmatprep.subr.bf16.mxu1 %v1531_v7  ;;  %v1281_v6 = vld [vmem:[%s2102_s6] ss:$0 sm:$0xff] }
  0x9f   : > { %629 = vmatpush1.bf16.msra.mxu0 %v1516_v16  ;;  %v531_v16 = vrot.slane %v526_v15, %v458_v23 }
  0xa0   : > { %630 = vmatprep.subr.bf16.mxu0 %v1517_v17  ;;  %1333 = vmatpush3.bf16.msra.mxu1 %v1532_v8  ;;  %v535_v17 = vrot.slane %v526_v15, %v468_v26 }
  0xa1   : > { %1334 = vmatprep.subr.bf16.mxu1 %v1533_v9 }
  0xa3   : > { %631 = vmatpush1.bf16.msra.mxu0 %v1519_v18 }
  0xa4   : > { %632 = vmatprep.subr.bf16.mxu0 %v1520_v19  ;;  %1335 = vmatpush3.bf16.msra.mxu1 %v1534_v10 }
  0xa5   : > { %1336 = vmatprep.subr.bf16.mxu1 %v1535_v11 }
  0xa7   : > { %633 = vmatpush1.bf16.msra.mxu0 %v1522_v20 }
  0xa8   : > { %1337 = vmatpush3.bf16.msra.mxu1 %v1536_v12 }
  0xa9   : > { %1338 = vmatprep.subr.bf16.mxu1 %v1537_v13 }
  0xac   : > { %1339 = vmatpush3.bf16.msra.mxu1 %v1538_v14 }
 0x10c   : > { %v454_v27 = vpop.permute.xlu0 %453  ;;  %v474_v29 = vpop.permute.xlu1 %473 }
 0x10d   : > { %v460_v31 = vmul.f32 %v459_v25, %v454_v27  ;;  %v480_v40 = vmul.f32 %v479_v34, %v474_v29 }
 0x10f   : > { %v461_v38 = vadd.f32 %v1258_v33, %v460_v31 }
 0x111   : > { %v464_v36 = vpop.permute.xlu0 %463  ;;  %v484_v37 = vpop.permute.xlu1 %483 }
 0x112   : > { %v470_v39 = vmul.f32 %v469_v32, %v464_v36  ;;  %v490_v42 = vmul.f32 %v489_v35, %v484_v37 }
 0x114   : > { %v471_v41 = vadd.f32 %v470_v39, %v461_v38 }
 0x116   : > { %v481_v43 = vadd.f32 %v480_v40, %v471_v41 }
 0x118   : > { %v491_v44 = vadd.f32 %v490_v42, %v481_v43 }
 0x11a   : > { %v492_v45 = vmul.f32 0.15915494, %v491_v44 }
 0x11c   : > { %v493_v46 = vadd.f32 0.5, %v492_v45 }
 0x11e   : > { %v494_v47 = vfloor.f32 %v493_v46 }
 0x120   : > { %v495_v48 = vmul.f32 6.2831855, %v494_v47 }
 0x122   : > { %v496_v49 = vsub.f32 %v491_v44, %v495_v48 }
 0x124   : > { %v497_v50 = vmul.f32 %v496_v49, %v496_v49 }
 0x126   : > { %v498_v51 = vmul.f32 -2.5052108e-08, %v497_v50 }
 0x128   : > { %v499_v52 = vadd.f32 2.7557319e-06, %v498_v51 }
 0x12a   : > { %v500_v53 = vmul.f32 %v499_v52, %v497_v50 }
 0x12c   : > { %v1259_v54 = vadd.f32 -0.0001984127, %v500_v53 }
 0x12e   : > { %v502_v55 = vmul.f32 %v1259_v54, %v497_v50 }
 0x130   : > { %v503_v56 = vadd.f32 0.008333334, %v502_v55 }
 0x132   : > { %v504_v57 = vmul.f32 %v503_v56, %v497_v50 }
 0x134   : > { %v1260_v58 = vadd.f32 -0.16666667, %v504_v57 }
 0x136   : > { %v506_v59 = vmul.f32 %v1260_v58, %v497_v50 }
 0x138   : > { %v507_v60 = vadd.f32 1.0, %v506_v59 }
 0x13a   : > { %v508_v61 = vmul.f32 %v507_v60, %v496_v49  ;;  %v1539_v60 = vld [vmem:[#allocation7] sm:$0xff]  }
 0x13c   : > { %v509_v62 = vpack.c.bf16 %v508_v61, %v508_v61  ;;  %v1755_v61 = vmov 0.0  }
 0x13d   : > { %1364 = vmatprep.subr.bf16.mxu0 %v1755_v61  ;;  %1384 = vmatprep.subr.bf16.mxu1 %v1755_v61 }
 0x13e   : > { %651 = vmatmul.mubr.bf16.vlgmr.msra.gmra.mrb[0].mxu0 %v509_v62  ;;  %v1540_v62 = vld [vmem:[#allocation7 + $0x8] sm:$0xff]  }
 0x13f   : > { %1365 = vmatpush3.bf16.msra.mxu0 %v1539_v60  ;;  %1380 = vmatprep.mubr.msk.bf16.mxu0 %vm1756_vm0, %v1755_v61 }
 0x140   : > { %1366 = vmatprep.subr.bf16.mxu0 %v1755_v61 }
 0x143   : > { %1367 = vmatpush3.bf16.msra.mxu0 %v1540_v62  ;;  %v1311_v62 = vld [vmem:[%s2106_s10] ss:$0 sm:$0xff] }
 0x144   : > { %1368 = vmatprep.subr.bf16.mxu0 %v1755_v61 }
 0x147   : > { %1369 = vmatpush3.bf16.msra.mxu0 %v1541_v63 }
 0x148   : > { %1370 = vmatprep.subr.bf16.mxu0 %v1755_v61 }
 0x14b   : > { %1371 = vmatpush3.bf16.msra.mxu0 %v1542_v0 }
 0x14c   : > { %1372 = vmatprep.subr.bf16.mxu0 %v1755_v61 }
 0x14f   : > { %1373 = vmatpush3.bf16.msra.mxu0 %v1543_v1 }
 0x150   : > { %1374 = vmatprep.subr.bf16.mxu0 %v1755_v61 }
 0x153   : > { %1375 = vmatpush3.bf16.msra.mxu0 %v1544_v2 }
 0x154   : > { %1376 = vmatprep.subr.bf16.mxu0 %v1755_v61 }
 0x157   : > { %1377 = vmatpush3.bf16.msra.mxu0 %v1545_v3 }
 0x158   : > { %1378 = vmatprep.subr.bf16.mxu0 %v1755_v61 }
 0x15b   : > { %1379 = vmatpush3.bf16.msra.mxu0 %v1546_v4 }
 0x211   : > { %v652_v18 = vpop.f32.mrb[0].mxu0 }
 0x212   : > { %v653_v19 = vadd.f32 %v652_v18, %v531_v16  ;;  %v654_v20 = vpop.f32.mrb[1].mxu0 }
 0x213   : > { %v655_v21 = vadd.f32 %v654_v20, %v535_v17  ;;  %v656_v24 = vpop.f32.mrb[2].mxu0 }
 0x214   : > { %v659_v25 = vmul.f32 0.15915494, %v653_v19  ;;  %v657_v27 = vpop.f32.mrb[3].mxu0 }
 0x215   : > { %v660_v28 = vmul.f32 0.15915494, %v655_v21 }
 0x216   : > { %v661_v29 = vadd.f32 0.5, %v659_v25 }
 0x217   : > { %v662_v30 = vadd.f32 0.5, %v660_v28 }
 0x218   : > { %v663_v31 = vfloor.f32 %v661_v29 }
 0x219   : > { %v664_v32 = vfloor.f32 %v662_v30 }
 0x21a   : > { %v665_v33 = vmul.f32 6.2831855, %v663_v31 }
 0x21b   : > { %v666_v34 = vmul.f32 6.2831855, %v664_v32 }
 0x21c   : > { %v667_v35 = vsub.f32 %v653_v19, %v665_v33  ;;  %v1547_v33 = vld [vmem:[#allocation8] sm:$0xff]  }
 0x21d   : > { %v668_v36 = vsub.f32 %v655_v21, %v666_v34  ;;  %v1548_v34 = vld [vmem:[#allocation8 + $0x8] sm:$0xff]  }
 0x21e   : > { %v669_v23 = vmul.f32 %v667_v35, %v667_v35 }
 0x21f   : > { %v670_v37 = vmul.f32 %v668_v36, %v668_v36 }
 0x220   : > { %v671_v22 = vmul.f32 -2.5052108e-08, %v669_v23 }
 0x221   : > { %v672_v26 = vmul.f32 -2.5052108e-08, %v670_v37 }
 0x222   : > { %v673_v38 = vadd.f32 2.7557319e-06, %v671_v22  ;;  %v1553_v22 = vld [vmem:[#allocation8 + $0x30] sm:$0xff]  }
 0x223   : > { %v674_v39 = vadd.f32 2.7557319e-06, %v672_v26  ;;  %v1554_v26 = vld [vmem:[#allocation8 + $0x38] sm:$0xff]  }
 0x224   : > { %v675_v40 = vmul.f32 %v673_v38, %v669_v23  ;;  %v1300_v38 = vld [vmem:[%s2104_s8] ss:$0 sm:$0xff] }
 0x225   : > { %v676_v41 = vmul.f32 %v674_v39, %v670_v37 }
 0x226   : > { %v1277_v42 = vadd.f32 -0.0001984127, %v675_v40 }
 0x227   : > { %v1278_v43 = vadd.f32 -0.0001984127, %v676_v41 }
 0x228   : > { %v679_v44 = vmul.f32 %v1277_v42, %v669_v23 }
 0x229   : > { %v680_v45 = vmul.f32 %v1278_v43, %v670_v37 }
 0x22a   : > { %v681_v46 = vadd.f32 0.008333334, %v679_v44 }
 0x22b   : > { %v682_v47 = vadd.f32 0.008333334, %v680_v45 }
 0x22c   : > { %v683_v48 = vmul.f32 %v681_v46, %v669_v23 }
 0x22d   : > { %v684_v49 = vmul.f32 %v682_v47, %v670_v37 }
 0x22e   : > { %v1279_v50 = vadd.f32 -0.16666667, %v683_v48 }
 0x22f   : > { %v1280_v51 = vadd.f32 -0.16666667, %v684_v49 }
 0x230   : > { %v687_v52 = vmul.f32 %v1279_v50, %v669_v23  ;;  %v1551_v23 = vld [vmem:[#allocation8 + $0x20] sm:$0xff]  }
 0x231   : > { %v688_v53 = vmul.f32 %v1280_v51, %v670_v37  ;;  %v1552_v37 = vld [vmem:[#allocation8 + $0x28] sm:$0xff]  }
 0x232   : > { %v689_v54 = vadd.f32 1.0, %v687_v52 }
 0x233   : > { %v690_v55 = vadd.f32 1.0, %v688_v53 }
 0x234   : > { %v691_v56 = vmul.f32 %v689_v54, %v667_v35  ;;  %v1549_v35 = vld [vmem:[#allocation8 + $0x10] sm:$0xff]  }
 0x235   : > { %v692_v57 = vmul.f32 %v690_v55, %v668_v36  ;;  %v1550_v36 = vld [vmem:[#allocation8 + $0x18] sm:$0xff]  }
 0x236   : > { %v693_v59 = vpack.c.bf16 %v691_v56, %v691_v56 }
 0x237   : > { %v694_v58 = vpack.c.bf16 %v692_v57, %v692_v57 }
 0x239   : > { %862 = vmatprep.mubr.bf16.mxu1 %v694_v58 }
 0x23a   : > { %863 = vmatmul.mubr.bf16.vlgmr.msra.gmra.mrb[0].mxu1 %v693_v59 }
 0x23b   : > { %1400 = vmatprep.mubr.msk.bf16.mxu1 %vm1756_vm0, %v1755_v61  ;;  %1385 = vmatpush3.bf16.msra.mxu1 %v1547_v33 }
 0x23c   : > { %1386 = vmatprep.subr.bf16.mxu1 %v1755_v61 }
 0x23f   : > { %1387 = vmatpush3.bf16.msra.mxu1 %v1548_v34 }
 0x240   : > { %1388 = vmatprep.subr.bf16.mxu1 %v1755_v61 }
 0x243   : > { %1389 = vmatpush3.bf16.msra.mxu1 %v1549_v35 }
 0x244   : > { %1390 = vmatprep.subr.bf16.mxu1 %v1755_v61 }
 0x247   : > { %1391 = vmatpush3.bf16.msra.mxu1 %v1550_v36 }
 0x248   : > { %1392 = vmatprep.subr.bf16.mxu1 %v1755_v61 }
 0x24b   : > { %1393 = vmatpush3.bf16.msra.mxu1 %v1551_v23 }
 0x24c   : > { %1394 = vmatprep.subr.bf16.mxu1 %v1755_v61 }
 0x24f   : > { %1395 = vmatpush3.bf16.msra.mxu1 %v1552_v37 }
 0x250   : > { %1396 = vmatprep.subr.bf16.mxu1 %v1755_v61 }
 0x253   : > { %1397 = vmatpush3.bf16.msra.mxu1 %v1553_v22 }
 0x254   : > { %1398 = vmatprep.subr.bf16.mxu1 %v1755_v61 }
 0x257   : > { %1399 = vmatpush3.bf16.msra.mxu1 %v1554_v26 }
 0x30d   : > { %v1340_v5 = vpop.f32.mrb[0].mxu1 }
 0x30e   : > { %v1341_v7 = vpop.f32.mrb[1].mxu1 }
 0x30f   : > { %v1342_v8 = vadd.f32 %v1341_v7, %v1340_v5  ;;  %v1343_v9 = vpop.f32.mrb[2].mxu1 }
 0x310   : > { %v1344_v10 = vpop.f32.mrb[3].mxu1 }
 0x311   : > { %v865_v11 = vadd.f32 %v1342_v8, %v1281_v6 }
 0x313   : > { %v870_v12 = vmul.f32 0.15915494, %v865_v11 }
 0x315   : > { %v871_v13 = vadd.f32 0.5, %v870_v12 }
 0x317   : > { %v872_v14 = vfloor.f32 %v871_v13 }
 0x319   : > { %v873_v15 = vmul.f32 6.2831855, %v872_v14 }
 0x31b   : > { %v874_v16 = vsub.f32 %v865_v11, %v873_v15 }
 0x31d   : > { %v875_v17 = vmul.f32 %v874_v16, %v874_v16 }
 0x31f   : > { %v876_v18 = vmul.f32 -2.5052108e-08, %v875_v17 }
 0x321   : > { %v877_v19 = vadd.f32 2.7557319e-06, %v876_v18 }
 0x323   : > { %v878_v20 = vmul.f32 %v877_v19, %v875_v17 }
 0x325   : > { %v1298_v21 = vadd.f32 -0.0001984127, %v878_v20 }
 0x327   : > { %v880_v24 = vmul.f32 %v1298_v21, %v875_v17 }
 0x329   : > { %v881_v25 = vadd.f32 0.008333334, %v880_v24 }
 0x32b   : > { %v882_v27 = vmul.f32 %v881_v25, %v875_v17 }
 0x32d   : > { %v1299_v28 = vadd.f32 -0.16666667, %v882_v27 }
 0x32f   : > { %v884_v29 = vmul.f32 %v1299_v28, %v875_v17 }
 0x331   : > { %v885_v30 = vadd.f32 1.0, %v884_v29 }
 0x333   : > { %v886_v31 = vmul.f32 %v885_v30, %v874_v16 }
 0x335   : > { %v887_v32 = vpack.c.bf16 %v886_v31, %v886_v31 }
 0x337   : > { %1381 = vmatmul.mubr.bf16.vlgmr.msra.gmra.mrb[4].mxu0 %v887_v32 }
 0x40a   : > { %v993_v39 = vpop.f32.mrb[4].mxu0 }
 0x40b   : > { %v994_v40 = vadd.f32 %v1300_v38, %v993_v39  ;;  %v1382_v41 = vpop.f32.mrb[5].mxu0 }
 0x40c   : > { %v996_v42 = vpop.f32.mrb[6].mxu0 }
 0x40d   : > { %v999_v43 = vmul.f32 0.15915494, %v994_v40  ;;  %v1383_v44 = vpop.f32.mrb[7].mxu0 }
 0x40f   : > { %v1000_v45 = vadd.f32 0.5, %v999_v43 }
 0x411   : > { %v1001_v46 = vfloor.f32 %v1000_v45 }
 0x413   : > { %v1002_v47 = vmul.f32 6.2831855, %v1001_v46 }
 0x415   : > { %v1003_v48 = vsub.f32 %v994_v40, %v1002_v47 }
 0x417   : > { %v1004_v49 = vmul.f32 %v1003_v48, %v1003_v48 }
 0x419   : > { %v1005_v50 = vmul.f32 -2.5052108e-08, %v1004_v49 }
 0x41b   : > { %v1006_v51 = vadd.f32 2.7557319e-06, %v1005_v50 }
 0x41d   : > { %v1007_v52 = vmul.f32 %v1006_v51, %v1004_v49 }
 0x41f   : > { %v1309_v53 = vadd.f32 -0.0001984127, %v1007_v52 }
 0x421   : > { %v1009_v54 = vmul.f32 %v1309_v53, %v1004_v49 }
 0x423   : > { %v1010_v55 = vadd.f32 0.008333334, %v1009_v54 }
 0x425   : > { %v1011_v56 = vmul.f32 %v1010_v55, %v1004_v49 }
 0x427   : > { %v1310_v57 = vadd.f32 -0.16666667, %v1011_v56 }
 0x429   : > { %v1013_v58 = vmul.f32 %v1310_v57, %v1004_v49 }
 0x42b   : > { %v1014_v59 = vadd.f32 1.0, %v1013_v58 }
 0x42d   : > { %v1015_v60 = vmul.f32 %v1014_v59, %v1003_v48 }
 0x42f   : > { %v1016_v61 = vpack.c.bf16 %v1015_v60, %v1015_v60 }
 0x431   : > { %1401 = vmatmul.mubr.bf16.vlgmr.msra.gmra.mrb[4].mxu1 %v1016_v61 }
 0x504   : > { %v1122_v63 = vpop.f32.mrb[4].mxu1 }
 0x505   : > { %v1123_v0 = vadd.f32 %v1311_v62, %v1122_v63  ;;  %v1402_v1 = vpop.f32.mrb[5].mxu1 }
 0x506   : > { %v1125_v2 = vpop.f32.mrb[6].mxu1 }
 0x507   : > { %v1128_v3 = vmax.f32 %v1123_v0, 0.0  ;;  %v1403_v4 = vpop.f32.mrb[7].mxu1 }
 0x509   : > { %1129 = vst [vmem:[%s436_s14] sm:$0xff] %v1128_v3 }
 0x50a   : > { %1680 = shalt.err (!%p1677_p0)
}
 0x50b   : > { %s1681_s20 = scalar_lea.hbm %s2054_s23, 128  ;;  %s1685_s28 = scalar_lea.hbm %s2107_s11, 256 }
 0x50c   : > { %p1682_p6 = scmp.ne.s32.totalorder %s2054_s23, %s1681_s20  ;;  %p1686_p13 = scmp.lt.u32.totalorder %s2054_s23, %s2107_s11 }
 0x50d   : > { %p1687_p12 = scmp.lt.u32.totalorder %s1685_s28, %s1681_s20  ;;  %p1689_p2 = scmp.lt.u32.totalorder %s1681_s20, %s2054_s23 }
 0x50e   : > { %p1683_p9 = pnand %p1682_p6, %p2143_p3 }
 0x50f   : > { %p1688_p1 = por %p1687_p12, %p1686_p13 }
 0x510   : > { %p1684_p10 = pneg %p1683_p9 }
 0x511   : > { %p1690_p4 = por %p1689_p2, %p1688_p1 }
 0x513   : > { %p1691_p7 = pnand %p1690_p4, %p1684_p10 }
 0x515   : > { %1694 = shalt.err (!%p1691_p7)
}
 0x516   : > { %1420 = dma.vmem_to_hbm [thread:$0]  (%p2143_p3), %s2056_s5, 128, %s2054_s23, %s1131_s19  }
 0x517 PF: > { %s2144_s13 = sld [smem:[#allocation17_spill]]  ;;  %s2145_s30 = sld [smem:[#allocation15_spill]] }
 0x518   : > { %s2146_s14 = sld [smem:[#allocation20_spill]] }
 0x51d   : > { %p1447_p8 = scmp.ge.s32.totalorder %s2144_s13, 2  ;;  %s1156_s22 = sand.u32 1, %s2145_s30  }
 0x51e   : > { %p2147_p11 = scmp.ne.s32.totalorder %s2146_s14, 0  ;;  %s1157_s26 = scalar_lea.sflag [#allocation4], %s1156_s22 }
 0x520   : > { %p1436_p5 = pnand %p1447_p8, %p2147_p11 }
 0x522   : > { %1724 = dma.done.wait (!%p1436_p5), %s1157_s26, 128  }
 0x523   : > { %1726 = vsyncadd (!%p1436_p5), %s1157_s26, 4294967168  ;;  %s2148_s20 = sld [smem:[#allocation18_spill]]  ;;  %s2149_s21 = sld [smem:[#allocation16_spill]] }
 0x524   : > { %s2150_s19 = sld [smem:[#allocation19_spill]]  ;;  %s2151_s17 = smov %s1733_s18 }
 0x529   : > { %p24_p0 = scmp.ge.s32.totalorder %s2148_s20, 4   ;;  %s2152_s18 = smov %s2149_s21 }
 0x52b   :  { %26 = sbr.rel (!%p24_p0) target bundleno = 8 (0x8), region = 116 }
 0x532   :  { %1162 = vsyncpa [#allocation3], 1 }
 0x533   :  { %1164 = vsyncpa [#allocation3 + $0x1], 1 }
 0x534   :  { %1165 = vsyncpa [#allocation6], 1 }
 0x535   :  { %1166 = vsyncpa [#allocation9], 1 }
 0x536   :  { %1167 = vsyncpa [#allocation4], 1 }
 0x537   :  { %1169 = vsyncpa [#allocation4 + $0x1], 1 }

// kernel: tpu_custom_call.1
= control target key start
LH: loop header
LB: loop body
LE: loop exit
PB: predicated region body
PF: predicated region fallthrough
CT: control target
= control target key end

     0   :  { %s2096_s0 = inlined_call_operand.vmem [shape: f32[16,4], index: 0, kind: input, shape index: {}]   ;;  %s2097_s1 = inlined_call_operand.vmem [shape: f32[4,128], index: 1, kind: input, shape index: {}]   ;;  %s2098_s2 = inlined_call_operand.vmem [shape: f32[1,128], index: 2, kind: input, shape index: {}]   ;;  %s2099_s3 = inlined_call_operand.hbm [shape: bf16[128,256], index: 3, kind: input, shape index: {}]   ;;  %s2100_s4 = inlined_call_operand.vmem [shape: f32[1,256], index: 4, kind: input, shape index: {}]   ;;  %s2101_s5 = inlined_call_operand.hbm [shape: bf16[256,128], index: 5, kind: input, shape index: {}]   ;;  %s2102_s6 = inlined_call_operand.vmem [shape: f32[1,128], index: 6, kind: input, shape index: {}]   ;;  %s2103_s7 = inlined_call_operand.hbm [shape: bf16[128,128], index: 7, kind: input, shape index: {}]   ;;  %s2104_s8 = inlined_call_operand.vmem [shape: f32[1,128], index: 8, kind: input, shape index: {}]   ;;  %s2105_s9 = inlined_call_operand.hbm [shape: bf16[128,128], index: 9, kind: input, shape index: {}]   ;;  %s2106_s10 = inlined_call_operand.vmem [shape: f32[1,128], index: 10, kind: input, shape index: {}]   ;;  %s2107_s11 = inlined_call_operand.hbm [shape: f32[16,128], index: 11, kind: output, shape index: {}]  }
   0x1   :  { %2121 = sst [smem:[#allocation21_spill]] %s2101_s5 }
   0x2   :  { %16 = vsyncpa [#allocation3], 0 }
   0x3   :  { %17 = vsyncpa [#allocation6], 0 }
   0x4   :  { %18 = vsyncpa [#allocation9], 0 }
   0x5   :  { %19 = vsyncpa [#allocation4], 0 }
   0x6   :  { %21 = vsyncpa [#allocation4 + $0x1], 0  ;;  %s1818_s17 = smov 0   ;;  %s1820_s18 = smov 0  }
   0x7   :  { %s1822_s19 = smov 0   ;;  %s1824_s20 = smov 0  }
   0x8 LB: > { %2122 = sst [smem:[#allocation15_spill]] %s1729_s17  ;;  %s1839_s21 = sadd.s32 4294967295, %s1741_s20   ;;  %s1741_s20 = sphi %s1824_s20, %s2148_s20   ;;  %s1737_s19 = sphi %s1822_s19, %s2150_s19   ;;  %s1733_s18 = sphi %s1820_s18, %s2152_s18   ;;  %s1729_s17 = sphi %s1818_s17, %s2151_s17  }
   0x9   : > { %2123 = sst [smem:[#allocation16_spill]] %s1737_s19  ;;  %s1244_s22 = sadd.s32 4294967294, %s1741_s20  }
   0xa   : > { %2124 = sst [smem:[#allocation17_spill]] %s1741_s20  ;;  %s1843_s23 = sadd.s32 1, %s1741_s20  }
   0xb   : > { %2125 = sst [smem:[#allocation18_spill]] %s1843_s23  ;;  %s270_s24 = sadd.s32 1, %s1737_s19 }
   0xc   : > { %s267_s25 = ssub.s32 %s1741_s20, %s1843_s23  ;;  %p280_p0 = scmp.ne.s32.totalorder %s1737_s19, %s1733_s18 }
   0xd   : > { %p268_p1 = scmp.eq.s32.totalorder %s267_s25, 0  ;;  %p281_p2 = scmp.eq.s32.totalorder %s1839_s21, 1 }
   0xe   : > { %p286_p3 = scmp.ne.s32.totalorder %s1733_s18, %s1729_s17  ;;  %p287_p4 = scmp.eq.s32.totalorder %s1244_s22, 1 }
   0xf   : > { %s1854_s26 = scalar_select %p268_p1, %s1737_s19, %s270_s24  }
  0x10   : > { %p1856_p5 = por %p281_p2, %p280_p0  ;;  %p1860_p6 = por %p287_p4, %p286_p3 }
  0x11   : > { %2126 = sst [smem:[#allocation19_spill]] %s1854_s26  ;;  %p1245_p7 = scmp.ge.s32.totalorder %s1741_s20, 1 }
  0x12   : > { %s2127_s27 = scalar_select %p1856_p5, 1, 0 }
  0x13   : > { %s2128_s28 = scalar_select %p1860_p6, 1, 0 }
  0x14   : > { %p294_p8 = scmp.lt.s32.totalorder %s1741_s20, 3  ;;  %p2109_p9 = scmp.eq.s32.totalorder %s1839_s21, 0 }
  0x15   : > { %2129 = sst [smem:[#allocation20_spill]] %s2128_s28  ;;  %s1743_s30 = smov [#allocation5]  }
  0x16   : > { %p1867_p10 = pnand %p1245_p7, %p294_p8  ;;  %s328_s12 = sshll.u32 %s1743_s30, 4  ;;  %s329_s12 = int_to_ptr.vmem [resolvable:$true] %s328_s12 }
  0x17   : > { %s1744_s14 = smov [#allocation2]   ;;  %s2132_s5 = sld [smem:[#allocation21_spill]] }
  0x18   : > { %s2130_s29 = scalar_select %p1867_p10, 1, 0 }
  0x19   : > { %p1422_p11 = pneg %p1867_p10  ;;  %s312_s15 = sshll.u32 %s1744_s14, 4  ;;  %s1879_s15 = int_to_ptr.vmem [resolvable:$true] %s312_s15 }
  0x1b   : > { %p1875_p12 = pnand %p2109_p9, %p1422_p11 }
  0x1d   : > { %s1555_s24 = scalar_lea.hbm %s2132_s5, 2048  ;;  %p1889_p0 = pneg %p1875_p12 }
  0x1e   : > { %p1556_p13 = scmp.ne.s32.totalorder %s2132_s5, %s1555_s24  ;;  %p1562_p3 = scmp.lt.u32.totalorder %s1555_s24, %s2132_s5 }
  0x20   : > { %p1558_p1 = pnand %p1889_p0, %p1556_p13 }
  0x22   : > { %p1559_p2 = pneg %p1558_p1 }
  0x24   : > { %p1564_p4 = pnand %p1562_p3, %p1559_p2 }
  0x26   : > { %1567 = shalt.err (!%p1564_p4)
}
  0x27   : > { %s1568_s16 = scalar_lea.vmem %s329_s12, 2048  ;;  %p1576_p9 = scmp.lt.s32.totalorder %s329_s12, %s329_s12 }
  0x28   : > { %p1569_p7 = scmp.ne.s32.totalorder %s329_s12, %s1568_s16  ;;  %p1577_p6 = scmp.lt.s32.totalorder %s1568_s16, %s1568_s16 }
  0x2a   : > { %p1571_p8 = pnand %p1569_p7, %p1889_p0  ;;  %p1578_p5 = por %p1577_p6, %p1576_p9 }
  0x2c   : > { %p1572_p11 = pneg %p1571_p8 }
  0x2e   : > { %p1579_p10 = pnand %p1578_p5, %p1572_p11 }
  0x30   : > { %1582 = shalt.err (!%p1579_p10)
}
  0x31   : > { %s2117_s26 = smov 64   ;;  %s2119_s22 = smov 4  }
  0x32   : > { %1428 = dma.hbm_to_vmem [thread:$0]  (!%p1875_p12), %s2132_s5, 2048, %s329_s12, [#allocation6], %s2117_s26, %s2117_s26, %s2119_s22  }
  0x33   : > { %s1583_s23 = scalar_lea.hbm %s2099_s3, 2048 }
  0x34   : > { %p1584_p5 = scmp.ne.s32.totalorder %s2099_s3, %s1583_s23  ;;  %p1590_p10 = scmp.lt.u32.totalorder %s1583_s23, %s2099_s3 }
  0x36   : > { %p1586_p6 = pnand %p1584_p5, %p1889_p0 }
  0x38   : > { %p1587_p9 = pneg %p1586_p6 }
  0x3a   : > { %p1592_p13 = pnand %p1590_p10, %p1587_p9 }
  0x3c   : > { %1595 = shalt.err (!%p1592_p13)
}
  0x3d   : > { %s1596_s12 = scalar_lea.vmem %s1879_s15, 2048  ;;  %p1604_p4 = scmp.lt.s32.totalorder %s1879_s15, %s1879_s15 }
  0x3e   : > { %p1597_p1 = scmp.ne.s32.totalorder %s1879_s15, %s1596_s12  ;;  %p1605_p7 = scmp.lt.s32.totalorder %s1596_s12, %s1596_s12 }
  0x40   : > { %p1599_p2 = pnand %p1597_p1, %p1889_p0  ;;  %p1606_p8 = por %p1605_p7, %p1604_p4 }
  0x42   : > { %p1600_p3 = pneg %p1599_p2 }
  0x44   : > { %p1607_p11 = pnand %p1606_p8, %p1600_p3 }
  0x46   : > { %1610 = shalt.err (!%p1607_p11)
}
  0x47   : > { %s1747_s28 = smov 128   ;;  %s1748_s17 = smov 8  }
  0x48   : > { %1425 = dma.hbm_to_vmem [thread:$0]  (!%p1875_p12), %s2099_s3, 2048, %s1879_s15, [#allocation3], %s1747_s28, %s1747_s28, %s1748_s17  }
  0x49   : > { %s1749_s19 = smov [#allocation7]   ;;  %s1750_s25 = smov [#allocation8]  }
  0x4a   : > { %s344_s24 = sshll.u32 %s1749_s19, 4  ;;  %s360_s14 = sshll.u32 %s1750_s25, 4  ;;  %s345_s24 = int_to_ptr.vmem [resolvable:$true] %s344_s24  ;;  %s1931_s14 = int_to_ptr.vmem [resolvable:$true] %s360_s14 }
  0x4b   : > { %s1611_s26 = scalar_lea.hbm %s2103_s7, 1024 }
  0x4c   : > { %p1612_p5 = scmp.ne.s32.totalorder %s2103_s7, %s1611_s26  ;;  %p1618_p10 = scmp.lt.u32.totalorder %s1611_s26, %s2103_s7 }
  0x4e   : > { %p1614_p6 = pnand %p1612_p5, %p1889_p0 }
  0x50   : > { %p1615_p9 = pneg %p1614_p6 }
  0x52   : > { %p1620_p13 = pnand %p1618_p10, %p1615_p9 }
  0x54   : > { %1623 = shalt.err (!%p1620_p13)
}
  0x55   : > { %s1624_s28 = scalar_lea.vmem %s345_s24, 1024  ;;  %p1632_p4 = scmp.lt.s32.totalorder %s345_s24, %s345_s24 }
  0x56   : > { %p1625_p1 = scmp.ne.s32.totalorder %s345_s24, %s1624_s28  ;;  %p1633_p7 = scmp.lt.s32.totalorder %s1624_s28, %s1624_s28 }
  0x58   : > { %p1627_p2 = pnand %p1625_p1, %p1889_p0  ;;  %p1634_p8 = por %p1633_p7, %p1632_p4 }
  0x5a   : > { %p1628_p3 = pneg %p1627_p2 }
  0x5c   : > { %p1635_p11 = pnand %p1634_p8, %p1628_p3 }
  0x5e   : > { %1638 = shalt.err (!%p1635_p11)
}
  0x5f   : > { %s2134_s5 = smov 4   ;;  %s2135_s22 = smov 64  }
  0x60   : > { %1431 = dma.hbm_to_vmem [thread:$0]  (!%p1875_p12), %s2103_s7, 1024, %s345_s24, [#allocation6], %s2135_s22, %s2135_s22, %s2134_s5  }
  0x61   : > { %s1639_s25 = scalar_lea.hbm %s2105_s9, 1024 }
  0x62   : > { %p1640_p5 = scmp.ne.s32.totalorder %s2105_s9, %s1639_s25  ;;  %p1646_p10 = scmp.lt.u32.totalorder %s1639_s25, %s2105_s9 }
  0x64   : > { %p1642_p6 = pnand %p1640_p5, %p1889_p0 }
  0x66   : > { %p1643_p9 = pneg %p1642_p6 }
  0x68   : > { %p1648_p13 = pnand %p1646_p10, %p1643_p9 }
  0x6a   : > { %1651 = shalt.err (!%p1648_p13)
}
  0x6b   : > { %s1652_s24 = scalar_lea.vmem %s1931_s14, 1024  ;;  %p1660_p4 = scmp.lt.s32.totalorder %s1931_s14, %s1931_s14 }
  0x6c   : > { %p1653_p1 = scmp.ne.s32.totalorder %s1931_s14, %s1652_s24  ;;  %p1661_p7 = scmp.lt.s32.totalorder %s1652_s24, %s1652_s24 }
  0x6e   : > { %p1655_p2 = pnand %p1653_p1, %p1889_p0  ;;  %p1662_p8 = por %p1661_p7, %p1660_p4 }
  0x70   : > { %p1656_p3 = pneg %p1655_p2 }
  0x72   : > { %p1663_p11 = pnand %p1662_p8, %p1656_p3 }
  0x74   : > { %1666 = shalt.err (!%p1663_p11)
}
  0x75   : > { %1434 = dma.hbm_to_vmem [thread:$0]  (!%p1875_p12), %s2105_s9, 1024, %s1931_s14, [#allocation9], %s2135_s22, %s2135_s22, %s2134_s5  }
  0x76   : > { %p2136_p5 = scmp.ne.s32.totalorder %s2130_s29, 0 }
  0x77   : > { %p2137_p0 = scmp.eq.s32.totalorder (!%p2136_p5), %s1839_s21, 0 }
  0x78   : > { %386 = sbr.rel (%p2136_p5) target bundleno = 1303 (0x517), region = 64 }
  0x7f   : > { %1712 = dma.done.wait (%p2137_p0), [#allocation3], 2048   ;;  %p2138_p6 = pmov %p2137_p0 }
  0x80   : > { %p2139_p9 = pmov %p2137_p0 }
  0x81   : > { %1714 = vsyncadd (%p2138_p6), [#allocation3], 4294965248 }
  0x82   : > { %1716 = dma.done.wait (%p2139_p9), [#allocation6], 3072   ;;  %p2140_p10 = pmov %p2137_p0 }
  0x83   : > { %p2141_p13 = pmov %p2137_p0 }
  0x84   : > { %1718 = vsyncadd (%p2140_p10), [#allocation6], 4294964224 }
  0x85   : > { %1720 = dma.done.wait (%p2141_p13), [#allocation9], 1024   ;;  %p2142_p12 = pmov %p2137_p0 }
  0x86   : > { %p437_p1 = scmp.lt.s32.totalorder %s1839_s21, 1  ;;  %v1751_v0 = vmov 0   ;;  %v1752_v1 = vmov 2   ;;  %v1753_v3 = vmov 1   ;;  %v1754_v4 = vmov 3   ;;  %v1523_v63 = vld [vmem:[#allocation5 + $0x40] sm:$0xff]  }
  0x87   : > { %1722 = vsyncadd (%p2142_p12), [#allocation9], 4294966272  ;;  %1494 = vset.pattern.permute.xlu0 %v1751_v0  ;;  %1496 = vset.pattern.permute.xlu1 %v1752_v1  ;;  %v1499_v5 = vld [vmem:[#allocation2 + $0x4] ss:$8 sps:$4 sm:$0xff]   ;;  %v1501_v6 = vld [vmem:[#allocation2] ss:$8 sps:$4 sm:$0xff]   ;;  %v456_v21 = vlaneseq }
  0x88   : > { %s438_s29 = scalar_select %p437_p1, %s1839_s21, 1  ;;  %650 = vmatprep.mubr.bf16.mxu0 %v1751_v0  ;;  %618 = vmatprep.subr.bf16.mxu0 %v1499_v5  ;;  %v1502_v7 = vld [vmem:[#allocation2 + $0x14] ss:$8 sps:$4 sm:$0xff]   ;;  %v1504_v8 = vld [vmem:[#allocation2 + $0x10] ss:$8 sps:$4 sm:$0xff]   ;;  %v1524_v0 = vld [vmem:[#allocation5] sm:$0xff]  }
  0x89   : > { %619 = vmatpush1.bf16.msra.mxu0 %v1501_v6  ;;  %v1505_v9 = vld [vmem:[#allocation2 + $0x24] ss:$8 sps:$4 sm:$0xff]   ;;  %v1507_v10 = vld [vmem:[#allocation2 + $0x20] ss:$8 sps:$4 sm:$0xff]   ;;  %v1508_v11 = vld [vmem:[#allocation2 + $0x34] ss:$8 sps:$4 sm:$0xff]   ;;  %1324 = vmatprep.subr.bf16.mxu1 %v1523_v63 }
  0x8a   : > { %s1257_s13 = sshll.u32 %s438_s29, 3  ;;  %620 = vmatprep.subr.bf16.mxu0 %v1502_v7  ;;  %v1510_v12 = vld [vmem:[#allocation2 + $0x30] ss:$8 sps:$4 sm:$0xff]   ;;  %v1511_v13 = vld [vmem:[#allocation2 + $0x44] ss:$8 sps:$4 sm:$0xff]   ;;  %v1999_v22 = vshrl.u32 %v456_v21, 7  ;;  %1325 = vmatpush3.bf16.msra.mxu1 %v1524_v0 }
  0x8b   : > { %s440_s5 = scalar_lea.vmem %s2096_s0, %s1257_s13  ;;  %v1513_v14 = vld [vmem:[#allocation2 + $0x40] ss:$8 sps:$4 sm:$0xff]   ;;  %v1514_v15 = vld [vmem:[#allocation2 + $0x54] ss:$8 sps:$4 sm:$0xff]   ;;  %v1516_v16 = vld [vmem:[#allocation2 + $0x50] ss:$8 sps:$4 sm:$0xff]  }
  0x8c   : > { %v442_v2 = vld [vmem:[%s440_s5] sm:$0xff]  ;;  %v1520_v19 = vld [vmem:[#allocation2 + $0x74] ss:$8 sps:$4 sm:$0xff]   ;;  %v1522_v20 = vld [vmem:[#allocation2 + $0x70] ss:$8 sps:$4 sm:$0xff]   ;;  %v458_v23 = vsub.s32 0, %v1999_v22 }
  0x8d   : > { %453 = vperm.xlu0 %1494, %v442_v2   ;;  %473 = vperm.xlu1 %1496, %v442_v2   ;;  %v1517_v17 = vld [vmem:[#allocation2 + $0x64] ss:$8 sps:$4 sm:$0xff]   ;;  %v1519_v18 = vld [vmem:[#allocation2 + $0x60] ss:$8 sps:$4 sm:$0xff]   ;;  %v468_v26 = vsub.s32 1, %v1999_v22  ;;  %v478_v28 = vsub.s32 2, %v1999_v22 }
  0x8e   : > { %621 = vmatpush1.bf16.msra.mxu0 %v1504_v8  ;;  %v443_v24 = vld [vmem:[%s2097_s1] sm:$0xf]  ;;  %v488_v30 = vsub.s32 3, %v1999_v22  ;;  %v1529_v5 = vld [vmem:[#allocation5 + $0x58] sm:$0xff]   ;;  %v1531_v7 = vld [vmem:[#allocation5 + $0x60] sm:$0xff]   ;;  %vm1756_vm0 = vmmov 0  }
  0x8f   : > { %622 = vmatprep.subr.bf16.mxu0 %v1505_v9  ;;  %v459_v25 = vrot.slane %v443_v24, %v458_v23  ;;  %v469_v32 = vrot.slane %v443_v24, %v468_v26  ;;  %v1258_v33 = vld [vmem:[%s2098_s2] ss:$0 sm:$0xff]  ;;  %v479_v34 = vrot.slane %v443_v24, %v478_v28  ;;  %v1530_v6 = vld [vmem:[#allocation5 + $0x18] sm:$0xff]   ;;  %v1532_v8 = vld [vmem:[#allocation5 + $0x20] sm:$0xff]   ;;  %s434_s28 = sand.u32 1, %s1733_s18   ;;  %s1321_s30 = sshll.u32 %s1839_s21, 7 }
  0x90   : > { %v489_v35 = vrot.slane %v443_v24, %v488_v30  ;;  %v1525_v1 = vld [vmem:[#allocation5 + $0x48] sm:$0xff]   ;;  %v1541_v63 = vld [vmem:[#allocation7 + $0x10] sm:$0xff]   ;;  %v1542_v0 = vld [vmem:[#allocation7 + $0x18] sm:$0xff]   ;;  %s1256_s17 = sshll.u32 %s434_s28, 3  ;;  %s2054_s23 = scalar_lea.hbm %s2107_s11, %s1321_s30 }
  0x91   : > { %1495 = vset.pattern.permute.xlu0 %v1753_v3  ;;  %1497 = vset.pattern.permute.xlu1 %v1754_v4  ;;  %v1527_v3 = vld [vmem:[#allocation5 + $0x50] sm:$0xff]   ;;  %v1533_v9 = vld [vmem:[#allocation5 + $0x68] sm:$0xff]   ;;  %s436_s14 = scalar_lea.vmem [#allocation10], %s1256_s17  ;;  %s1131_s19 = scalar_lea.sflag [#allocation4], %s434_s28 }
  0x92   : > { %463 = vperm.xlu0 %1495, %v442_v2   ;;  %483 = vperm.xlu1 %1497, %v442_v2   ;;  %v1526_v2 = vld [vmem:[#allocation5 + $0x8] sm:$0xff]   ;;  %s1144_s5 = sshll.u32 %s436_s14, 4  ;;  %p2143_p3 = scmp.ne.s32.totalorder %s2127_s27, 0  ;;  %s2056_s5 = int_to_ptr.vmem [resolvable:$true] %s1144_s5 }
  0x93   : > { %623 = vmatpush1.bf16.msra.mxu0 %v1507_v10  ;;  %1326 = vmatprep.subr.bf16.mxu1 %v1525_v1  ;;  %v1534_v10 = vld [vmem:[#allocation5 + $0x28] sm:$0xff]   ;;  %v1543_v1 = vld [vmem:[#allocation7 + $0x20] sm:$0xff]   ;;  %s1667_s21 = scalar_lea.vmem %s2056_s5, 128  ;;  %s1757_s25 = smov [#allocation10]  }
  0x94   : > { %624 = vmatprep.subr.bf16.mxu0 %v1508_v11  ;;  %1327 = vmatpush3.bf16.msra.mxu1 %v1526_v2  ;;  %v1535_v11 = vld [vmem:[#allocation5 + $0x70] sm:$0xff]   ;;  %v1544_v2 = vld [vmem:[#allocation7 + $0x28] sm:$0xff]   ;;  %p1668_p2 = scmp.ne.s32.totalorder %s2056_s5, %s1667_s21  ;;  %s1671_s16 = sshll.u32 %s1757_s25, 4  ;;  %s1672_s16 = int_to_ptr.vmem [resolvable:$false] %s1671_s16 }
  0x95   : > { %1328 = vmatprep.subr.bf16.mxu1 %v1527_v3  ;;  %v1545_v3 = vld [vmem:[#allocation7 + $0x30] sm:$0xff]   ;;  %s1673_s12 = scalar_lea.vmem %s1672_s16, 256  ;;  %p1674_p8 = scmp.lt.s32.totalorder %s2056_s5, %s1672_s16 }
  0x96   : > { %1498 = vset.pattern.permute.xlu0 %v1754_v4  ;;  %v1528_v4 = vld [vmem:[#allocation5 + $0x10] sm:$0xff]   ;;  %p1669_p4 = pnand %p1668_p2, %p2143_p3  ;;  %p1675_p11 = scmp.lt.s32.totalorder %s1673_s12, %s1667_s21 }
  0x97   : > { %625 = vmatpush1.bf16.msra.mxu0 %v1510_v12  ;;  %v1536_v12 = vld [vmem:[#allocation5 + $0x30] sm:$0xff]  }
  0x98   : > { %626 = vmatprep.subr.bf16.mxu0 %v1511_v13  ;;  %1329 = vmatpush3.bf16.msra.mxu1 %v1528_v4  ;;  %v1537_v13 = vld [vmem:[#allocation5 + $0x78] sm:$0xff]   ;;  %p1670_p7 = pneg %p1669_p4  ;;  %p1676_p5 = por %p1675_p11, %p1674_p8 }
  0x99   : > { %1330 = vmatprep.subr.bf16.mxu1 %v1529_v5  ;;  %v1546_v4 = vld [vmem:[#allocation7 + $0x38] sm:$0xff]  }
  0x9a   : > { %p1677_p0 = pnand %p1676_p5, %p1670_p7 }
  0x9b   : > { %627 = vmatpush1.bf16.msra.mxu0 %v1513_v14  ;;  %v1538_v14 = vld [vmem:[#allocation5 + $0x38] sm:$0xff]  }
  0x9c   : > { %628 = vmatprep.subr.bf16.mxu0 %v1514_v15  ;;  %1331 = vmatpush3.bf16.msra.mxu1 %v1530_v6  ;;  %v526_v15 = vld [vmem:[%s2100_s4] sm:$0x3] }
  0x9d   : > { %1332 = vmatprep.subr.bf16.mxu1 %v1531_v7  ;;  %v1281_v6 = vld [vmem:[%s2102_s6] ss:$0 sm:$0xff] }
  0x9f   : > { %629 = vmatpush1.bf16.msra.mxu0 %v1516_v16  ;;  %v531_v16 = vrot.slane %v526_v15, %v458_v23 }
  0xa0   : > { %630 = vmatprep.subr.bf16.mxu0 %v1517_v17  ;;  %1333 = vmatpush3.bf16.msra.mxu1 %v1532_v8  ;;  %v535_v17 = vrot.slane %v526_v15, %v468_v26 }
  0xa1   : > { %1334 = vmatprep.subr.bf16.mxu1 %v1533_v9 }
  0xa3   : > { %631 = vmatpush1.bf16.msra.mxu0 %v1519_v18 }
  0xa4   : > { %632 = vmatprep.subr.bf16.mxu0 %v1520_v19  ;;  %1335 = vmatpush3.bf16.msra.mxu1 %v1534_v10 }
  0xa5   : > { %1336 = vmatprep.subr.bf16.mxu1 %v1535_v11 }
  0xa7   : > { %633 = vmatpush1.bf16.msra.mxu0 %v1522_v20 }
  0xa8   : > { %1337 = vmatpush3.bf16.msra.mxu1 %v1536_v12 }
  0xa9   : > { %1338 = vmatprep.subr.bf16.mxu1 %v1537_v13 }
  0xac   : > { %1339 = vmatpush3.bf16.msra.mxu1 %v1538_v14 }
 0x10c   : > { %v454_v27 = vpop.permute.xlu0 %453  ;;  %v474_v29 = vpop.permute.xlu1 %473 }
 0x10d   : > { %v460_v31 = vmul.f32 %v459_v25, %v454_v27  ;;  %v480_v40 = vmul.f32 %v479_v34, %v474_v29 }
 0x10f   : > { %v461_v38 = vadd.f32 %v1258_v33, %v460_v31 }
 0x111   : > { %v464_v36 = vpop.permute.xlu0 %463  ;;  %v484_v37 = vpop.permute.xlu1 %483 }
 0x112   : > { %v470_v39 = vmul.f32 %v469_v32, %v464_v36  ;;  %v490_v42 = vmul.f32 %v489_v35, %v484_v37 }
 0x114   : > { %v471_v41 = vadd.f32 %v470_v39, %v461_v38 }
 0x116   : > { %v481_v43 = vadd.f32 %v480_v40, %v471_v41 }
 0x118   : > { %v491_v44 = vadd.f32 %v490_v42, %v481_v43 }
 0x11a   : > { %v492_v45 = vmul.f32 0.15915494, %v491_v44 }
 0x11c   : > { %v493_v46 = vadd.f32 0.5, %v492_v45 }
 0x11e   : > { %v494_v47 = vfloor.f32 %v493_v46 }
 0x120   : > { %v495_v48 = vmul.f32 6.2831855, %v494_v47 }
 0x122   : > { %v496_v49 = vsub.f32 %v491_v44, %v495_v48 }
 0x124   : > { %v497_v50 = vmul.f32 %v496_v49, %v496_v49 }
 0x126   : > { %v498_v51 = vmul.f32 -2.5052108e-08, %v497_v50 }
 0x128   : > { %v499_v52 = vadd.f32 2.7557319e-06, %v498_v51 }
 0x12a   : > { %v500_v53 = vmul.f32 %v499_v52, %v497_v50 }
 0x12c   : > { %v1259_v54 = vadd.f32 -0.0001984127, %v500_v53 }
 0x12e   : > { %v502_v55 = vmul.f32 %v1259_v54, %v497_v50 }
 0x130   : > { %v503_v56 = vadd.f32 0.008333334, %v502_v55 }
 0x132   : > { %v504_v57 = vmul.f32 %v503_v56, %v497_v50 }
 0x134   : > { %v1260_v58 = vadd.f32 -0.16666667, %v504_v57 }
 0x136   : > { %v506_v59 = vmul.f32 %v1260_v58, %v497_v50 }
 0x138   : > { %v507_v60 = vadd.f32 1.0, %v506_v59 }
 0x13a   : > { %v508_v61 = vmul.f32 %v507_v60, %v496_v49  ;;  %v1539_v60 = vld [vmem:[#allocation7] sm:$0xff]  }
 0x13c   : > { %v509_v62 = vpack.c.bf16 %v508_v61, %v508_v61  ;;  %v1755_v61 = vmov 0.0  }
 0x13d   : > { %1364 = vmatprep.subr.bf16.mxu0 %v1755_v61  ;;  %1384 = vmatprep.subr.bf16.mxu1 %v1755_v61 }
 0x13e   : > { %651 = vmatmul.mubr.bf16.vlgmr.msra.gmra.mrb[0].mxu0 %v509_v62  ;;  %v1540_v62 = vld [vmem:[#allocation7 + $0x8] sm:$0xff]  }
 0x13f   : > { %1365 = vmatpush3.bf16.msra.mxu0 %v1539_v60  ;;  %1380 = vmatprep.mubr.msk.bf16.mxu0 %vm1756_vm0, %v1755_v61 }
 0x140   : > { %1366 = vmatprep.subr.bf16.mxu0 %v1755_v61 }
 0x143   : > { %1367 = vmatpush3.bf16.msra.mxu0 %v1540_v62  ;;  %v1311_v62 = vld [vmem:[%s2106_s10] ss:$0 sm:$0xff] }
 0x144   : > { %1368 = vmatprep.subr.bf16.mxu0 %v1755_v61 }
 0x147   : > { %1369 = vmatpush3.bf16.msra.mxu0 %v1541_v63 }
 0x148   : > { %1370 = vmatprep.subr.bf16.mxu0 %v1755_v61 }
 0x14b   : > { %1371 = vmatpush3.bf16.msra.mxu0 %v1542_v0 }
 0x14c   : > { %1372 = vmatprep.subr.bf16.mxu0 %v1755_v61 }
 0x14f   : > { %1373 = vmatpush3.bf16.msra.mxu0 %v1543_v1 }
 0x150   : > { %1374 = vmatprep.subr.bf16.mxu0 %v1755_v61 }
 0x153   : > { %1375 = vmatpush3.bf16.msra.mxu0 %v1544_v2 }
 0x154   : > { %1376 = vmatprep.subr.bf16.mxu0 %v1755_v61 }
 0x157   : > { %1377 = vmatpush3.bf16.msra.mxu0 %v1545_v3 }
 0x158   : > { %1378 = vmatprep.subr.bf16.mxu0 %v1755_v61 }
 0x15b   : > { %1379 = vmatpush3.bf16.msra.mxu0 %v1546_v4 }
 0x211   : > { %v652_v18 = vpop.f32.mrb[0].mxu0 }
 0x212   : > { %v653_v19 = vadd.f32 %v652_v18, %v531_v16  ;;  %v654_v20 = vpop.f32.mrb[1].mxu0 }
 0x213   : > { %v655_v21 = vadd.f32 %v654_v20, %v535_v17  ;;  %v656_v24 = vpop.f32.mrb[2].mxu0 }
 0x214   : > { %v659_v25 = vmul.f32 0.15915494, %v653_v19  ;;  %v657_v27 = vpop.f32.mrb[3].mxu0 }
 0x215   : > { %v660_v28 = vmul.f32 0.15915494, %v655_v21 }
 0x216   : > { %v661_v29 = vadd.f32 0.5, %v659_v25 }
 0x217   : > { %v662_v30 = vadd.f32 0.5, %v660_v28 }
 0x218   : > { %v663_v31 = vfloor.f32 %v661_v29 }
 0x219   : > { %v664_v32 = vfloor.f32 %v662_v30 }
 0x21a   : > { %v665_v33 = vmul.f32 6.2831855, %v663_v31 }
 0x21b   : > { %v666_v34 = vmul.f32 6.2831855, %v664_v32 }
 0x21c   : > { %v667_v35 = vsub.f32 %v653_v19, %v665_v33  ;;  %v1547_v33 = vld [vmem:[#allocation8] sm:$0xff]  }
 0x21d   : > { %v668_v36 = vsub.f32 %v655_v21, %v666_v34  ;;  %v1548_v34 = vld [vmem:[#allocation8 + $0x8] sm:$0xff]  }
 0x21e   : > { %v669_v23 = vmul.f32 %v667_v35, %v667_v35 }
 0x21f   : > { %v670_v37 = vmul.f32 %v668_v36, %v668_v36 }
 0x220   : > { %v671_v22 = vmul.f32 -2.5052108e-08, %v669_v23 }
 0x221   : > { %v672_v26 = vmul.f32 -2.5052108e-08, %v670_v37 }
 0x222   : > { %v673_v38 = vadd.f32 2.7557319e-06, %v671_v22  ;;  %v1553_v22 = vld [vmem:[#allocation8 + $0x30] sm:$0xff]  }
 0x223   : > { %v674_v39 = vadd.f32 2.7557319e-06, %v672_v26  ;;  %v1554_v26 = vld [vmem:[#allocation8 + $0x38] sm:$0xff]  }
 0x224   : > { %v675_v40 = vmul.f32 %v673_v38, %v669_v23  ;;  %v1300_v38 = vld [vmem:[%s2104_s8] ss:$0 sm:$0xff] }
 0x225   : > { %v676_v41 = vmul.f32 %v674_v39, %v670_v37 }
 0x226   : > { %v1277_v42 = vadd.f32 -0.0001984127, %v675_v40 }
 0x227   : > { %v1278_v43 = vadd.f32 -0.0001984127, %v676_v41 }
 0x228   : > { %v679_v44 = vmul.f32 %v1277_v42, %v669_v23 }
 0x229   : > { %v680_v45 = vmul.f32 %v1278_v43, %v670_v37 }
 0x22a   : > { %v681_v46 = vadd.f32 0.008333334, %v679_v44 }
 0x22b   : > { %v682_v47 = vadd.f32 0.008333334, %v680_v45 }
 0x22c   : > { %v683_v48 = vmul.f32 %v681_v46, %v669_v23 }
 0x22d   : > { %v684_v49 = vmul.f32 %v682_v47, %v670_v37 }
 0x22e   : > { %v1279_v50 = vadd.f32 -0.16666667, %v683_v48 }
 0x22f   : > { %v1280_v51 = vadd.f32 -0.16666667, %v684_v49 }
 0x230   : > { %v687_v52 = vmul.f32 %v1279_v50, %v669_v23  ;;  %v1551_v23 = vld [vmem:[#allocation8 + $0x20] sm:$0xff]  }
 0x231   : > { %v688_v53 = vmul.f32 %v1280_v51, %v670_v37  ;;  %v1552_v37 = vld [vmem:[#allocation8 + $0x28] sm:$0xff]  }
 0x232   : > { %v689_v54 = vadd.f32 1.0, %v687_v52 }
 0x233   : > { %v690_v55 = vadd.f32 1.0, %v688_v53 }
 0x234   : > { %v691_v56 = vmul.f32 %v689_v54, %v667_v35  ;;  %v1549_v35 = vld [vmem:[#allocation8 + $0x10] sm:$0xff]  }
 0x235   : > { %v692_v57 = vmul.f32 %v690_v55, %v668_v36  ;;  %v1550_v36 = vld [vmem:[#allocation8 + $0x18] sm:$0xff]  }
 0x236   : > { %v693_v59 = vpack.c.bf16 %v691_v56, %v691_v56 }
 0x237   : > { %v694_v58 = vpack.c.bf16 %v692_v57, %v692_v57 }
 0x239   : > { %862 = vmatprep.mubr.bf16.mxu1 %v694_v58 }
 0x23a   : > { %863 = vmatmul.mubr.bf16.vlgmr.msra.gmra.mrb[0].mxu1 %v693_v59 }
 0x23b   : > { %1400 = vmatprep.mubr.msk.bf16.mxu1 %vm1756_vm0, %v1755_v61  ;;  %1385 = vmatpush3.bf16.msra.mxu1 %v1547_v33 }
 0x23c   : > { %1386 = vmatprep.subr.bf16.mxu1 %v1755_v61 }
 0x23f   : > { %1387 = vmatpush3.bf16.msra.mxu1 %v1548_v34 }
 0x240   : > { %1388 = vmatprep.subr.bf16.mxu1 %v1755_v61 }
 0x243   : > { %1389 = vmatpush3.bf16.msra.mxu1 %v1549_v35 }
 0x244   : > { %1390 = vmatprep.subr.bf16.mxu1 %v1755_v61 }
 0x247   : > { %1391 = vmatpush3.bf16.msra.mxu1 %v1550_v36 }
 0x248   : > { %1392 = vmatprep.subr.bf16.mxu1 %v1755_v61 }
 0x24b   : > { %1393 = vmatpush3.bf16.msra.mxu1 %v1551_v23 }
 0x24c   : > { %1394 = vmatprep.subr.bf16.mxu1 %v1755_v61 }
 0x24f   : > { %1395 = vmatpush3.bf16.msra.mxu1 %v1552_v37 }
 0x250   : > { %1396 = vmatprep.subr.bf16.mxu1 %v1755_v61 }
 0x253   : > { %1397 = vmatpush3.bf16.msra.mxu1 %v1553_v22 }
 0x254   : > { %1398 = vmatprep.subr.bf16.mxu1 %v1755_v61 }
 0x257   : > { %1399 = vmatpush3.bf16.msra.mxu1 %v1554_v26 }
 0x30d   : > { %v1340_v5 = vpop.f32.mrb[0].mxu1 }
 0x30e   : > { %v1341_v7 = vpop.f32.mrb[1].mxu1 }
 0x30f   : > { %v1342_v8 = vadd.f32 %v1341_v7, %v1340_v5  ;;  %v1343_v9 = vpop.f32.mrb[2].mxu1 }
 0x310   : > { %v1344_v10 = vpop.f32.mrb[3].mxu1 }
 0x311   : > { %v865_v11 = vadd.f32 %v1342_v8, %v1281_v6 }
 0x313   : > { %v870_v12 = vmul.f32 0.15915494, %v865_v11 }
 0x315   : > { %v871_v13 = vadd.f32 0.5, %v870_v12 }
 0x317   : > { %v872_v14 = vfloor.f32 %v871_v13 }
 0x319   : > { %v873_v15 = vmul.f32 6.2831855, %v872_v14 }
 0x31b   : > { %v874_v16 = vsub.f32 %v865_v11, %v873_v15 }
 0x31d   : > { %v875_v17 = vmul.f32 %v874_v16, %v874_v16 }
 0x31f   : > { %v876_v18 = vmul.f32 -2.5052108e-08, %v875_v17 }
 0x321   : > { %v877_v19 = vadd.f32 2.7557319e-06, %v876_v18 }
 0x323   : > { %v878_v20 = vmul.f32 %v877_v19, %v875_v17 }
 0x325   : > { %v1298_v21 = vadd.f32 -0.0001984127, %v878_v20 }
 0x327   : > { %v880_v24 = vmul.f32 %v1298_v21, %v875_v17 }
 0x329   : > { %v881_v25 = vadd.f32 0.008333334, %v880_v24 }
 0x32b   : > { %v882_v27 = vmul.f32 %v881_v25, %v875_v17 }
 0x32d   : > { %v1299_v28 = vadd.f32 -0.16666667, %v882_v27 }
 0x32f   : > { %v884_v29 = vmul.f32 %v1299_v28, %v875_v17 }
 0x331   : > { %v885_v30 = vadd.f32 1.0, %v884_v29 }
 0x333   : > { %v886_v31 = vmul.f32 %v885_v30, %v874_v16 }
 0x335   : > { %v887_v32 = vpack.c.bf16 %v886_v31, %v886_v31 }
 0x337   : > { %1381 = vmatmul.mubr.bf16.vlgmr.msra.gmra.mrb[4].mxu0 %v887_v32 }
 0x40a   : > { %v993_v39 = vpop.f32.mrb[4].mxu0 }
 0x40b   : > { %v994_v40 = vadd.f32 %v1300_v38, %v993_v39  ;;  %v1382_v41 = vpop.f32.mrb[5].mxu0 }
 0x40c   : > { %v996_v42 = vpop.f32.mrb[6].mxu0 }
 0x40d   : > { %v999_v43 = vmul.f32 0.15915494, %v994_v40  ;;  %v1383_v44 = vpop.f32.mrb[7].mxu0 }
 0x40f   : > { %v1000_v45 = vadd.f32 0.5, %v999_v43 }
 0x411   : > { %v1001_v46 = vfloor.f32 %v1000_v45 }
 0x413   : > { %v1002_v47 = vmul.f32 6.2831855, %v1001_v46 }
 0x415   : > { %v1003_v48 = vsub.f32 %v994_v40, %v1002_v47 }
 0x417   : > { %v1004_v49 = vmul.f32 %v1003_v48, %v1003_v48 }
 0x419   : > { %v1005_v50 = vmul.f32 -2.5052108e-08, %v1004_v49 }
 0x41b   : > { %v1006_v51 = vadd.f32 2.7557319e-06, %v1005_v50 }
 0x41d   : > { %v1007_v52 = vmul.f32 %v1006_v51, %v1004_v49 }
 0x41f   : > { %v1309_v53 = vadd.f32 -0.0001984127, %v1007_v52 }
 0x421   : > { %v1009_v54 = vmul.f32 %v1309_v53, %v1004_v49 }
 0x423   : > { %v1010_v55 = vadd.f32 0.008333334, %v1009_v54 }
 0x425   : > { %v1011_v56 = vmul.f32 %v1010_v55, %v1004_v49 }
 0x427   : > { %v1310_v57 = vadd.f32 -0.16666667, %v1011_v56 }
 0x429   : > { %v1013_v58 = vmul.f32 %v1310_v57, %v1004_v49 }
 0x42b   : > { %v1014_v59 = vadd.f32 1.0, %v1013_v58 }
 0x42d   : > { %v1015_v60 = vmul.f32 %v1014_v59, %v1003_v48 }
 0x42f   : > { %v1016_v61 = vpack.c.bf16 %v1015_v60, %v1015_v60 }
 0x431   : > { %1401 = vmatmul.mubr.bf16.vlgmr.msra.gmra.mrb[4].mxu1 %v1016_v61 }
 0x504   : > { %v1122_v63 = vpop.f32.mrb[4].mxu1 }
 0x505   : > { %v1123_v0 = vadd.f32 %v1311_v62, %v1122_v63  ;;  %v1402_v1 = vpop.f32.mrb[5].mxu1 }
 0x506   : > { %v1125_v2 = vpop.f32.mrb[6].mxu1 }
 0x507   : > { %v1128_v3 = vmax.f32 %v1123_v0, 0.0  ;;  %v1403_v4 = vpop.f32.mrb[7].mxu1 }
 0x509   : > { %1129 = vst [vmem:[%s436_s14] sm:$0xff] %v1128_v3 }
 0x50a   : > { %1680 = shalt.err (!%p1677_p0)
}
 0x50b   : > { %s1681_s20 = scalar_lea.hbm %s2054_s23, 128  ;;  %s1685_s28 = scalar_lea.hbm %s2107_s11, 256 }
 0x50c   : > { %p1682_p6 = scmp.ne.s32.totalorder %s2054_s23, %s1681_s20  ;;  %p1686_p13 = scmp.lt.u32.totalorder %s2054_s23, %s2107_s11 }
 0x50d   : > { %p1687_p12 = scmp.lt.u32.totalorder %s1685_s28, %s1681_s20  ;;  %p1689_p2 = scmp.lt.u32.totalorder %s1681_s20, %s2054_s23 }
 0x50e   : > { %p1683_p9 = pnand %p1682_p6, %p2143_p3 }
 0x50f   : > { %p1688_p1 = por %p1687_p12, %p1686_p13 }
 0x510   : > { %p1684_p10 = pneg %p1683_p9 }
 0x511   : > { %p1690_p4 = por %p1689_p2, %p1688_p1 }
 0x513   : > { %p1691_p7 = pnand %p1690_p4, %p1684_p10 }
 0x515   : > { %1694 = shalt.err (!%p1691_p7)
}
 0x516   : > { %1420 = dma.vmem_to_hbm [thread:$0]  (%p2143_p3), %s2056_s5, 128, %s2054_s23, %s1131_s19  }
 0x517 PF: > { %s2144_s13 = sld [smem:[#allocation17_spill]]  ;;  %s2145_s30 = sld [smem:[#allocation15_spill]] }
 0x518   : > { %s2146_s14 = sld [smem:[#allocation20_spill]] }
 0x51d   : > { %p1447_p8 = scmp.ge.s32.totalorder %s2144_s13, 2  ;;  %s1156_s22 = sand.u32 1, %s2145_s30  }
 0x51e   : > { %p2147_p11 = scmp.ne.s32.totalorder %s2146_s14, 0  ;;  %s1157_s26 = scalar_lea.sflag [#allocation4], %s1156_s22 }
 0x520   : > { %p1436_p5 = pnand %p1447_p8, %p2147_p11 }
 0x522   : > { %1724 = dma.done.wait (!%p1436_p5), %s1157_s26, 128  }
 0x523   : > { %1726 = vsyncadd (!%p1436_p5), %s1157_s26, 4294967168  ;;  %s2148_s20 = sld [smem:[#allocation18_spill]]  ;;  %s2149_s21 = sld [smem:[#allocation16_spill]] }
 0x524   : > { %s2150_s19 = sld [smem:[#allocation19_spill]]  ;;  %s2151_s17 = smov %s1733_s18 }
 0x529   : > { %p24_p0 = scmp.ge.s32.totalorder %s2148_s20, 4   ;;  %s2152_s18 = smov %s2149_s21 }
 0x52b   :  { %26 = sbr.rel (!%p24_p0) target bundleno = 8 (0x8), region = 116 }
 0x532   :  { %1162 = vsyncpa [#allocation3], 1 }
 0x533   :  { %1164 = vsyncpa [#allocation3 + $0x1], 1 }
 0x534   :  { %1165 = vsyncpa [#allocation6], 1 }
 0x535   :  { %1166 = vsyncpa [#allocation9], 1 }
 0x536   :  { %1167 = vsyncpa [#allocation4], 1 }
 0x537   :  { %1169 = vsyncpa [#allocation4 + $0x1], 1 }

</bundles_post_ra>
